<compile_context>
chip_gen: v7x
topology: tpu7x:2x2x1
jax: 0.10.0
libtpu: 0.0.40
codegen_flags: <defaults>
</compile_context>

<pallas_src>
import functools

import jax
import jax.numpy as jnp
from jax.experimental import pallas as pl
from jax.experimental.pallas import tpu as pltpu


LANE = 128     # TPU vreg lane width; each gate / the output is padded to this.
SUBLANE = 8    # f32 sublane packing.


def lstm_kernel(x_ref, w_ih_ref, w_hh_ref, b_ref, w_lin_ref, b_lin_ref,
                out_ref, gx_ref, *, seq_len):
    """Full LSTM forward + final Linear, one kernel invocation.

    x_ref:     (Sp, I)       float32 (rows seq_len..Sp-1 are zero padding)
    w_ih_ref:  (I, 4*Hp)     gate order [i, f, g, o], each gate padded to Hp lanes
    w_hh_ref:  (Hp, 4*Hp)    padded rows H..Hp-1 are zero
    b_ref:     (1, 4*Hp)     b_ih + b_hh, padded lanes zero
    w_lin_ref: (Hp, Op)      padded rows/cols zero
    b_lin_ref: (1, Op)
    out_ref:   (1, Op)       lane-dense output (Op multiple of 128)
    gx_ref:    (Sp, 4*Hp)    VMEM scratch: hoisted input projection
    """
    Hp = w_hh_ref.shape[0]

    # Hoisted input projection + bias: one (Sp, I) x (I, 4*Hp) matmul that
    # fills the MXU once instead of seq_len separate M=1 matmuls.
    gx_ref[...] = (
        jnp.dot(x_ref[...], w_ih_ref[...], preferred_element_type=jnp.float32)
        + b_ref[...]
    )

    def step(t, carry):
        h, c = carry
        # Only the recurrent (1,Hp) x (Hp,4*Hp) matmul is on the serial path.
        gates = gx_ref[pl.ds(t, 1), :] + jnp.dot(
            h, w_hh_ref[...], preferred_element_type=jnp.float32)
        # Each gate slice is a whole number of 128-lane vregs (lane aligned,
        # static offsets -> no cross-lane shuffles).
        i_g = jax.nn.sigmoid(gates[:, 0 * Hp:1 * Hp])
        f_g = jax.nn.sigmoid(gates[:, 1 * Hp:2 * Hp])
        g_g = jnp.tanh(gates[:, 2 * Hp:3 * Hp])
        o_g = jax.nn.sigmoid(gates[:, 3 * Hp:4 * Hp])
        c = f_g * c + i_g * g_g
        h = o_g * jnp.tanh(c)
        return h, c

    h0 = jnp.zeros((1, Hp), jnp.float32)
    c0 = jnp.zeros((1, Hp), jnp.float32)
    # h/c live in vregs as loop carries; unroll short loops fully so the LLO
    # scheduler can overlap EUP/VPU gate tails with the next step's MXU push.
    unroll = True if seq_len <= 32 else 8
    h, _ = jax.lax.fori_loop(0, seq_len, step, (h0, c0), unroll=unroll)

    # predictions[-1] = Linear(h_T); Op is a multiple of 128 -> unmasked store.
    out_ref[...] = (
        jnp.dot(h, w_lin_ref[...], preferred_element_type=jnp.float32)
        + b_lin_ref[...]
    )


def _round_up(n, m):
    return ((n + m - 1) // m) * m


def lstm_model_forward(x, w_ih, w_hh, b_ih, b_hh, w_lin, b_lin):
    """x: (seq_len, input_size). Weights in PyTorch layout. Returns (output_size,)."""
    x = jnp.asarray(x, jnp.float32)
    S, I = x.shape
    H = w_hh.shape[1]
    O = w_lin.shape[0]
    Hp = _round_up(H, LANE)
    Op = _round_up(O, LANE)
    Sp = _round_up(S, SUBLANE)

    def pad_gate_cols(w):
        # (rows, 4*H) -> (rows, 4*Hp): pad each gate's H columns up to Hp so
        # each gate occupies whole 128-lane vregs inside the kernel.
        r = w.shape[0]
        w4 = w.reshape(r, 4, H)
        w4 = jnp.pad(w4, ((0, 0), (0, 0), (0, Hp - H)))
        return w4.reshape(r, 4 * Hp)

    x_p = jnp.pad(x, ((0, Sp - S), (0, 0)))                                # (Sp, I)
    w_ih_p = pad_gate_cols(jnp.asarray(w_ih, jnp.float32).T)               # (I, 4*Hp)
    w_hh_p = pad_gate_cols(
        jnp.pad(jnp.asarray(w_hh, jnp.float32).T, ((0, Hp - H), (0, 0))))  # (Hp, 4*Hp)
    b_p = pad_gate_cols(
        (jnp.asarray(b_ih, jnp.float32)
         + jnp.asarray(b_hh, jnp.float32)).reshape(1, 4 * H))              # (1, 4*Hp)
    w_lin_p = jnp.pad(jnp.asarray(w_lin, jnp.float32).T,
                      ((0, Hp - H), (0, Op - O)))                          # (Hp, Op)
    b_lin_p = jnp.pad(jnp.asarray(b_lin, jnp.float32).reshape(1, O),
                      ((0, 0), (0, Op - O)))                               # (1, Op)

    out = pl.pallas_call(
        functools.partial(lstm_kernel, seq_len=S),
        out_shape=jax.ShapeDtypeStruct((1, Op), jnp.float32),
        scratch_shapes=[pltpu.VMEM((Sp, 4 * Hp), jnp.float32)],
        compiler_params=pltpu.CompilerParams(vmem_limit_bytes=32 << 20),
    )(x_p, w_ih_p, w_hh_p, b_p, w_lin_p, b_lin_p)
    return out[0, :O]


def lstm_model_reference(x, w_ih, w_hh, b_ih, b_hh, w_lin, b_lin):
    """Pure-JAX reference of the PyTorch forward, for correctness checking."""
    H = w_hh.shape[1]

    def step(carry, x_t):
        h, c = carry
        gates = x_t @ w_ih.T + h @ w_hh.T + b_ih + b_hh
        i = jax.nn.sigmoid(gates[0 * H:1 * H])
        f = jax.nn.sigmoid(gates[1 * H:2 * H])
        g = jnp.tanh(gates[2 * H:3 * H])
        o = jax.nn.sigmoid(gates[3 * H:4 * H])
        c = f * c + i * g
        h = o * jnp.tanh(c)
        return (h, c), h

    h0 = jnp.zeros((H,), jnp.float32)
    (_, _), hs = jax.lax.scan(step, (h0, h0), x)
    preds = hs @ w_lin.T + b_lin
    return preds[-1]


if __name__ == "__main__":
    seq_len, input_size, hidden, output_size = 8, 4, 32, 1

    key = jax.random.PRNGKey(0)
    k_x, k1, k2, k3, k4, k5, k6 = jax.random.split(key, 7)
    bound = 1.0 / jnp.sqrt(hidden)

    x = jax.random.normal(k_x, (seq_len, input_size), jnp.float32)
    w_ih = jax.random.uniform(k1, (4 * hidden, input_size), jnp.float32, -bound, bound)
    w_hh = jax.random.uniform(k2, (4 * hidden, hidden), jnp.float32, -bound, bound)
    b_ih = jax.random.uniform(k3, (4 * hidden,), jnp.float32, -bound, bound)
    b_hh = jax.random.uniform(k4, (4 * hidden,), jnp.float32, -bound, bound)
    w_lin = jax.random.uniform(k5, (output_size, hidden), jnp.float32, -bound, bound)
    b_lin = jax.random.uniform(k6, (output_size,), jnp.float32, -bound, bound)

    out = lstm_model_forward(x, w_ih, w_hh, b_ih, b_hh, w_lin, b_lin)
    out = jax.block_until_ready(out)

    ref = lstm_model_reference(x, w_ih, w_hh, b_ih, b_hh, w_lin, b_lin)
    assert out.shape == (output_size,)
    assert jnp.allclose(out, ref, atol=1e-5, rtol=1e-5), (out, ref)

    print("KERNEL_OK")
</pallas_src>

<mosaic_0001>
module attributes {stable_mosaic.version = 11 : i64} {
  func.func @lstm_kernel(%arg0: memref<8x4xf32, #tpu.memory_space<vmem>>, %arg1: memref<4x512xf32, #tpu.memory_space<vmem>>, %arg2: memref<128x512xf32, #tpu.memory_space<vmem>>, %arg3: memref<1x512xf32, #tpu.memory_space<vmem>>, %arg4: memref<128x128xf32, #tpu.memory_space<vmem>>, %arg5: memref<1x128xf32, #tpu.memory_space<vmem>>, %arg6: memref<1x128xf32, #tpu.memory_space<vmem>>, %arg7: memref<8x512xf32, #tpu.memory_space<vmem>>) attributes {dimension_semantics = [], scalar_prefetch = 0 : i64, scratch_operands = 1 : i64, tpu.core_type = #tpu.core_type<tc>} {
    %c0 = arith.constant 0 : index
    %c0_0 = arith.constant 0 : index
    %0 = vector.load %arg0[%c0, %c0_0] : memref<8x4xf32, #tpu.memory_space<vmem>>, vector<8x4xf32>
    %c0_1 = arith.constant 0 : index
    %c0_2 = arith.constant 0 : index
    %1 = vector.load %arg1[%c0_1, %c0_2] : memref<4x512xf32, #tpu.memory_space<vmem>>, vector<4x512xf32>
    %cst = arith.constant dense<0.000000e+00> : vector<8x512xf32>
    %2 = tpu.matmul %0, %1, %cst {dimension_numbers = #tpu.dot_dimension_numbers<[1], [0], [0], [1], [0, 0, 1, 1], [], []>} : vector<8x4xf32>, vector<4x512xf32>, vector<8x512xf32> -> vector<8x512xf32>
    %c0_3 = arith.constant 0 : index
    %c0_4 = arith.constant 0 : index
    %3 = vector.load %arg3[%c0_3, %c0_4] : memref<1x512xf32, #tpu.memory_space<vmem>>, vector<1x512xf32>
    %4 = vector.broadcast %3 : vector<1x512xf32> to vector<8x512xf32>
    %5 = arith.addf %2, %4 : vector<8x512xf32>
    %c0_5 = arith.constant 0 : index
    %c0_6 = arith.constant 0 : index
    %6 = vector.load %arg7[%c0_5, %c0_6] : memref<8x512xf32, #tpu.memory_space<vmem>>, vector<8x512xf32>
    tpu.vector_store %arg7[%c0_5, %c0_6], %5 {strides = array<i32>} : memref<8x512xf32, #tpu.memory_space<vmem>>, vector<8x512xf32>,
    %cst_7 = arith.constant 0.000000e+00 : f32
    %7 = vector.broadcast %cst_7 : f32 to vector<1x128xf32>
    %cst_8 = arith.constant 0.000000e+00 : f32
    %8 = vector.broadcast %cst_8 : f32 to vector<1x128xf32>
    %c0_i32 = arith.constant 0 : i32
    %9 = arith.index_cast %c0_i32 : i32 to index
    %c0_9 = arith.constant 0 : index
    %10 = vector.load %arg7[%9, %c0_9] : memref<8x512xf32, #tpu.memory_space<vmem>>, vector<1x512xf32>
    %c0_10 = arith.constant 0 : index
    %c0_11 = arith.constant 0 : index
    %11 = vector.load %arg2[%c0_10, %c0_11] : memref<128x512xf32, #tpu.memory_space<vmem>>, vector<128x512xf32>
    %cst_12 = arith.constant dense<0.000000e+00> : vector<1x512xf32>
    %12 = tpu.matmul %7, %11, %cst_12 {dimension_numbers = #tpu.dot_dimension_numbers<[1], [0], [0], [1], [0, 0, 1, 1], [], []>} : vector<1x128xf32>, vector<128x512xf32>, vector<1x512xf32> -> vector<1x512xf32>
    %13 = arith.addf %10, %12 : vector<1x512xf32>
    %14 = vector.extract_strided_slice %13 {offsets = [0, 0], sizes = [1, 128], strides = [1, 1]} : vector<1x512xf32> to vector<1x128xf32>
    %15 = arith.negf %14 : vector<1x128xf32>
    %16 = math.exp %15 : vector<1x128xf32>
    %cst_13 = arith.constant 1.000000e+00 : f32
    %17 = vector.broadcast %cst_13 : f32 to vector<1x128xf32>
    %18 = arith.addf %17, %16 : vector<1x128xf32>
    %19 = arith.divf %17, %18 : vector<1x128xf32>
    %20 = vector.extract_strided_slice %13 {offsets = [0, 128], sizes = [1, 128], strides = [1, 1]} : vector<1x512xf32> to vector<1x128xf32>
    %21 = arith.negf %20 : vector<1x128xf32>
    %22 = math.exp %21 : vector<1x128xf32>
    %cst_14 = arith.constant 1.000000e+00 : f32
    %23 = vector.broadcast %cst_14 : f32 to vector<1x128xf32>
    %24 = arith.addf %23, %22 : vector<1x128xf32>
    %25 = arith.divf %23, %24 : vector<1x128xf32>
    %26 = vector.extract_strided_slice %13 {offsets = [0, 256], sizes = [1, 128], strides = [1, 1]} : vector<1x512xf32> to vector<1x128xf32>
    %27 = math.tanh %26 : vector<1x128xf32>
    %28 = vector.extract_strided_slice %13 {offsets = [0, 384], sizes = [1, 128], strides = [1, 1]} : vector<1x512xf32> to vector<1x128xf32>
    %29 = arith.negf %28 : vector<1x128xf32>
    %30 = math.exp %29 : vector<1x128xf32>
    %cst_15 = arith.constant 1.000000e+00 : f32
    %31 = vector.broadcast %cst_15 : f32 to vector<1x128xf32>
    %32 = arith.addf %31, %30 : vector<1x128xf32>
    %33 = arith.divf %31, %32 : vector<1x128xf32>
    %34 = arith.mulf %25, %8 : vector<1x128xf32>
    %35 = arith.mulf %19, %27 : vector<1x128xf32>
    %36 = arith.addf %34, %35 : vector<1x128xf32>
    %37 = math.tanh %36 : vector<1x128xf32>
    %38 = arith.mulf %33, %37 : vector<1x128xf32>
    %c1_i32 = arith.constant 1 : i32
    %39 = arith.index_cast %c1_i32 : i32 to index
    %c0_16 = arith.constant 0 : index
    %40 = vector.load %arg7[%39, %c0_16] : memref<8x512xf32, #tpu.memory_space<vmem>>, vector<1x512xf32>
    %c0_17 = arith.constant 0 : index
    %c0_18 = arith.constant 0 : index
    %41 = vector.load %arg2[%c0_17, %c0_18] : memref<128x512xf32, #tpu.memory_space<vmem>>, vector<128x512xf32>
    %cst_19 = arith.constant dense<0.000000e+00> : vector<1x512xf32>
    %42 = tpu.matmul %38, %41, %cst_19 {dimension_numbers = #tpu.dot_dimension_numbers<[1], [0], [0], [1], [0, 0, 1, 1], [], []>} : vector<1x128xf32>, vector<128x512xf32>, vector<1x512xf32> -> vector<1x512xf32>
    %43 = arith.addf %40, %42 : vector<1x512xf32>
    %44 = vector.extract_strided_slice %43 {offsets = [0, 0], sizes = [1, 128], strides = [1, 1]} : vector<1x512xf32> to vector<1x128xf32>
    %45 = arith.negf %44 : vector<1x128xf32>
    %46 = math.exp %45 : vector<1x128xf32>
    %cst_20 = arith.constant 1.000000e+00 : f32
    %47 = vector.broadcast %cst_20 : f32 to vector<1x128xf32>
    %48 = arith.addf %47, %46 : vector<1x128xf32>
    %49 = arith.divf %47, %48 : vector<1x128xf32>
    %50 = vector.extract_strided_slice %43 {offsets = [0, 128], sizes = [1, 128], strides = [1, 1]} : vector<1x512xf32> to vector<1x128xf32>
    %51 = arith.negf %50 : vector<1x128xf32>
    %52 = math.exp %51 : vector<1x128xf32>
    %cst_21 = arith.constant 1.000000e+00 : f32
    %53 = vector.broadcast %cst_21 : f32 to vector<1x128xf32>
    %54 = arith.addf %53, %52 : vector<1x128xf32>
    %55 = arith.divf %53, %54 : vector<1x128xf32>
    %56 = vector.extract_strided_slice %43 {offsets = [0, 256], sizes = [1, 128], strides = [1, 1]} : vector<1x512xf32> to vector<1x128xf32>
    %57 = math.tanh %56 : vector<1x128xf32>
    %58 = vector.extract_strided_slice %43 {offsets = [0, 384], sizes = [1, 128], strides = [1, 1]} : vector<1x512xf32> to vector<1x128xf32>
    %59 = arith.negf %58 : vector<1x128xf32>
    %60 = math.exp %59 : vector<1x128xf32>
    %cst_22 = arith.constant 1.000000e+00 : f32
    %61 = vector.broadcast %cst_22 : f32 to vector<1x128xf32>
    %62 = arith.addf %61, %60 : vector<1x128xf32>
    %63 = arith.divf %61, %62 : vector<1x128xf32>
    %64 = arith.mulf %55, %36 : vector<1x128xf32>
    %65 = arith.mulf %49, %57 : vector<1x128xf32>
    %66 = arith.addf %64, %65 : vector<1x128xf32>
    %67 = math.tanh %66 : vector<1x128xf32>
    %68 = arith.mulf %63, %67 : vector<1x128xf32>
    %c2_i32 = arith.constant 2 : i32
    %69 = arith.index_cast %c2_i32 : i32 to index
    %c0_23 = arith.constant 0 : index
    %70 = vector.load %arg7[%69, %c0_23] : memref<8x512xf32, #tpu.memory_space<vmem>>, vector<1x512xf32>
    %c0_24 = arith.constant 0 : index
    %c0_25 = arith.constant 0 : index
    %71 = vector.load %arg2[%c0_24, %c0_25] : memref<128x512xf32, #tpu.memory_space<vmem>>, vector<128x512xf32>
    %cst_26 = arith.constant dense<0.000000e+00> : vector<1x512xf32>
    %72 = tpu.matmul %68, %71, %cst_26 {dimension_numbers = #tpu.dot_dimension_numbers<[1], [0], [0], [1], [0, 0, 1, 1], [], []>} : vector<1x128xf32>, vector<128x512xf32>, vector<1x512xf32> -> vector<1x512xf32>
    %73 = arith.addf %70, %72 : vector<1x512xf32>
    %74 = vector.extract_strided_slice %73 {offsets = [0, 0], sizes = [1, 128], strides = [1, 1]} : vector<1x512xf32> to vector<1x128xf32>
    %75 = arith.negf %74 : vector<1x128xf32>
    %76 = math.exp %75 : vector<1x128xf32>
    %cst_27 = arith.constant 1.000000e+00 : f32
    %77 = vector.broadcast %cst_27 : f32 to vector<1x128xf32>
    %78 = arith.addf %77, %76 : vector<1x128xf32>
    %79 = arith.divf %77, %78 : vector<1x128xf32>
    %80 = vector.extract_strided_slice %73 {offsets = [0, 128], sizes = [1, 128], strides = [1, 1]} : vector<1x512xf32> to vector<1x128xf32>
    %81 = arith.negf %80 : vector<1x128xf32>
    %82 = math.exp %81 : vector<1x128xf32>
    %cst_28 = arith.constant 1.000000e+00 : f32
    %83 = vector.broadcast %cst_28 : f32 to vector<1x128xf32>
    %84 = arith.addf %83, %82 : vector<1x128xf32>
    %85 = arith.divf %83, %84 : vector<1x128xf32>
    %86 = vector.extract_strided_slice %73 {offsets = [0, 256], sizes = [1, 128], strides = [1, 1]} : vector<1x512xf32> to vector<1x128xf32>
    %87 = math.tanh %86 : vector<1x128xf32>
    %88 = vector.extract_strided_slice %73 {offsets = [0, 384], sizes = [1, 128], strides = [1, 1]} : vector<1x512xf32> to vector<1x128xf32>
    %89 = arith.negf %88 : vector<1x128xf32>
    %90 = math.exp %89 : vector<1x128xf32>
    %cst_29 = arith.constant 1.000000e+00 : f32
    %91 = vector.broadcast %cst_29 : f32 to vector<1x128xf32>
    %92 = arith.addf %91, %90 : vector<1x128xf32>
    %93 = arith.divf %91, %92 : vector<1x128xf32>
    %94 = arith.mulf %85, %66 : vector<1x128xf32>
    %95 = arith.mulf %79, %87 : vector<1x128xf32>
    %96 = arith.addf %94, %95 : vector<1x128xf32>
    %97 = math.tanh %96 : vector<1x128xf32>
    %98 = arith.mulf %93, %97 : vector<1x128xf32>
    %c3_i32 = arith.constant 3 : i32
    %99 = arith.index_cast %c3_i32 : i32 to index
    %c0_30 = arith.constant 0 : index
    %100 = vector.load %arg7[%99, %c0_30] : memref<8x512xf32, #tpu.memory_space<vmem>>, vector<1x512xf32>
    %c0_31 = arith.constant 0 : index
    %c0_32 = arith.constant 0 : index
    %101 = vector.load %arg2[%c0_31, %c0_32] : memref<128x512xf32, #tpu.memory_space<vmem>>, vector<128x512xf32>
    %cst_33 = arith.constant dense<0.000000e+00> : vector<1x512xf32>
    %102 = tpu.matmul %98, %101, %cst_33 {dimension_numbers = #tpu.dot_dimension_numbers<[1], [0], [0], [1], [0, 0, 1, 1], [], []>} : vector<1x128xf32>, vector<128x512xf32>, vector<1x512xf32> -> vector<1x512xf32>
    %103 = arith.addf %100, %102 : vector<1x512xf32>
    %104 = vector.extract_strided_slice %103 {offsets = [0, 0], sizes = [1, 128], strides = [1, 1]} : vector<1x512xf32> to vector<1x128xf32>
    %105 = arith.negf %104 : vector<1x128xf32>
    %106 = math.exp %105 : vector<1x128xf32>
    %cst_34 = arith.constant 1.000000e+00 : f32
    %107 = vector.broadcast %cst_34 : f32 to vector<1x128xf32>
    %108 = arith.addf %107, %106 : vector<1x128xf32>
    %109 = arith.divf %107, %108 : vector<1x128xf32>
    %110 = vector.extract_strided_slice %103 {offsets = [0, 128], sizes = [1, 128], strides = [1, 1]} : vector<1x512xf32> to vector<1x128xf32>
    %111 = arith.negf %110 : vector<1x128xf32>
    %112 = math.exp %111 : vector<1x128xf32>
    %cst_35 = arith.constant 1.000000e+00 : f32
    %113 = vector.broadcast %cst_35 : f32 to vector<1x128xf32>
    %114 = arith.addf %113, %112 : vector<1x128xf32>
    %115 = arith.divf %113, %114 : vector<1x128xf32>
    %116 = vector.extract_strided_slice %103 {offsets = [0, 256], sizes = [1, 128], strides = [1, 1]} : vector<1x512xf32> to vector<1x128xf32>
    %117 = math.tanh %116 : vector<1x128xf32>
    %118 = vector.extract_strided_slice %103 {offsets = [0, 384], sizes = [1, 128], strides = [1, 1]} : vector<1x512xf32> to vector<1x128xf32>
    %119 = arith.negf %118 : vector<1x128xf32>
    %120 = math.exp %119 : vector<1x128xf32>
    %cst_36 = arith.constant 1.000000e+00 : f32
    %121 = vector.broadcast %cst_36 : f32 to vector<1x128xf32>
    %122 = arith.addf %121, %120 : vector<1x128xf32>
    %123 = arith.divf %121, %122 : vector<1x128xf32>
    %124 = arith.mulf %115, %96 : vector<1x128xf32>
    %125 = arith.mulf %109, %117 : vector<1x128xf32>
    %126 = arith.addf %124, %125 : vector<1x128xf32>
    %127 = math.tanh %126 : vector<1x128xf32>
    %128 = arith.mulf %123, %127 : vector<1x128xf32>
    %c4_i32 = arith.constant 4 : i32
    %129 = arith.index_cast %c4_i32 : i32 to index
    %c0_37 = arith.constant 0 : index
    %130 = vector.load %arg7[%129, %c0_37] : memref<8x512xf32, #tpu.memory_space<vmem>>, vector<1x512xf32>
    %c0_38 = arith.constant 0 : index
    %c0_39 = arith.constant 0 : index
    %131 = vector.load %arg2[%c0_38, %c0_39] : memref<128x512xf32, #tpu.memory_space<vmem>>, vector<128x512xf32>
    %cst_40 = arith.constant dense<0.000000e+00> : vector<1x512xf32>
    %132 = tpu.matmul %128, %131, %cst_40 {dimension_numbers = #tpu.dot_dimension_numbers<[1], [0], [0], [1], [0, 0, 1, 1], [], []>} : vector<1x128xf32>, vector<128x512xf32>, vector<1x512xf32> -> vector<1x512xf32>
    %133 = arith.addf %130, %132 : vector<1x512xf32>
    %134 = vector.extract_strided_slice %133 {offsets = [0, 0], sizes = [1, 128], strides = [1, 1]} : vector<1x512xf32> to vector<1x128xf32>
    %135 = arith.negf %134 : vector<1x128xf32>
    %136 = math.exp %135 : vector<1x128xf32>
    %cst_41 = arith.constant 1.000000e+00 : f32
    %137 = vector.broadcast %cst_41 : f32 to vector<1x128xf32>
    %138 = arith.addf %137, %136 : vector<1x128xf32>
    %139 = arith.divf %137, %138 : vector<1x128xf32>
    %140 = vector.extract_strided_slice %133 {offsets = [0, 128], sizes = [1, 128], strides = [1, 1]} : vector<1x512xf32> to vector<1x128xf32>
    %141 = arith.negf %140 : vector<1x128xf32>
    %142 = math.exp %141 : vector<1x128xf32>
    %cst_42 = arith.constant 1.000000e+00 : f32
    %143 = vector.broadcast %cst_42 : f32 to vector<1x128xf32>
    %144 = arith.addf %143, %142 : vector<1x128xf32>
    %145 = arith.divf %143, %144 : vector<1x128xf32>
    %146 = vector.extract_strided_slice %133 {offsets = [0, 256], sizes = [1, 128], strides = [1, 1]} : vector<1x512xf32> to vector<1x128xf32>
    %147 = math.tanh %146 : vector<1x128xf32>
    %148 = vector.extract_strided_slice %133 {offsets = [0, 384], sizes = [1, 128], strides = [1, 1]} : vector<1x512xf32> to vector<1x128xf32>
    %149 = arith.negf %148 : vector<1x128xf32>
    %150 = math.exp %149 : vector<1x128xf32>
    %cst_43 = arith.constant 1.000000e+00 : f32
    %151 = vector.broadcast %cst_43 : f32 to vector<1x128xf32>
    %152 = arith.addf %151, %150 : vector<1x128xf32>
    %153 = arith.divf %151, %152 : vector<1x128xf32>
    %154 = arith.mulf %145, %126 : vector<1x128xf32>
    %155 = arith.mulf %139, %147 : vector<1x128xf32>
    %156 = arith.addf %154, %155 : vector<1x128xf32>
    %157 = math.tanh %156 : vector<1x128xf32>
    %158 = arith.mulf %153, %157 : vector<1x128xf32>
    %c5_i32 = arith.constant 5 : i32
    %159 = arith.index_cast %c5_i32 : i32 to index
    %c0_44 = arith.constant 0 : index
    %160 = vector.load %arg7[%159, %c0_44] : memref<8x512xf32, #tpu.memory_space<vmem>>, vector<1x512xf32>
    %c0_45 = arith.constant 0 : index
    %c0_46 = arith.constant 0 : index
    %161 = vector.load %arg2[%c0_45, %c0_46] : memref<128x512xf32, #tpu.memory_space<vmem>>, vector<128x512xf32>
    %cst_47 = arith.constant dense<0.000000e+00> : vector<1x512xf32>
    %162 = tpu.matmul %158, %161, %cst_47 {dimension_numbers = #tpu.dot_dimension_numbers<[1], [0], [0], [1], [0, 0, 1, 1], [], []>} : vector<1x128xf32>, vector<128x512xf32>, vector<1x512xf32> -> vector<1x512xf32>
    %163 = arith.addf %160, %162 : vector<1x512xf32>
    %164 = vector.extract_strided_slice %163 {offsets = [0, 0], sizes = [1, 128], strides = [1, 1]} : vector<1x512xf32> to vector<1x128xf32>
    %165 = arith.negf %164 : vector<1x128xf32>
    %166 = math.exp %165 : vector<1x128xf32>
    %cst_48 = arith.constant 1.000000e+00 : f32
    %167 = vector.broadcast %cst_48 : f32 to vector<1x128xf32>
    %168 = arith.addf %167, %166 : vector<1x128xf32>
    %169 = arith.divf %167, %168 : vector<1x128xf32>
    %170 = vector.extract_strided_slice %163 {offsets = [0, 128], sizes = [1, 128], strides = [1, 1]} : vector<1x512xf32> to vector<1x128xf32>
    %171 = arith.negf %170 : vector<1x128xf32>
    %172 = math.exp %171 : vector<1x128xf32>
    %cst_49 = arith.constant 1.000000e+00 : f32
    %173 = vector.broadcast %cst_49 : f32 to vector<1x128xf32>
    %174 = arith.addf %173, %172 : vector<1x128xf32>
    %175 = arith.divf %173, %174 : vector<1x128xf32>
    %176 = vector.extract_strided_slice %163 {offsets = [0, 256], sizes = [1, 128], strides = [1, 1]} : vector<1x512xf32> to vector<1x128xf32>
    %177 = math.tanh %176 : vector<1x128xf32>
    %178 = vector.extract_strided_slice %163 {offsets = [0, 384], sizes = [1, 128], strides = [1, 1]} : vector<1x512xf32> to vector<1x128xf32>
    %179 = arith.negf %178 : vector<1x128xf32>
    %180 = math.exp %179 : vector<1x128xf32>
    %cst_50 = arith.constant 1.000000e+00 : f32
    %181 = vector.broadcast %cst_50 : f32 to vector<1x128xf32>
    %182 = arith.addf %181, %180 : vector<1x128xf32>
    %183 = arith.divf %181, %182 : vector<1x128xf32>
    %184 = arith.mulf %175, %156 : vector<1x128xf32>
    %185 = arith.mulf %169, %177 : vector<1x128xf32>
    %186 = arith.addf %184, %185 : vector<1x128xf32>
    %187 = math.tanh %186 : vector<1x128xf32>
    %188 = arith.mulf %183, %187 : vector<1x128xf32>
    %c6_i32 = arith.constant 6 : i32
    %189 = arith.index_cast %c6_i32 : i32 to index
    %c0_51 = arith.constant 0 : index
    %190 = vector.load %arg7[%189, %c0_51] : memref<8x512xf32, #tpu.memory_space<vmem>>, vector<1x512xf32>
    %c0_52 = arith.constant 0 : index
    %c0_53 = arith.constant 0 : index
    %191 = vector.load %arg2[%c0_52, %c0_53] : memref<128x512xf32, #tpu.memory_space<vmem>>, vector<128x512xf32>
    %cst_54 = arith.constant dense<0.000000e+00> : vector<1x512xf32>
    %192 = tpu.matmul %188, %191, %cst_54 {dimension_numbers = #tpu.dot_dimension_numbers<[1], [0], [0], [1], [0, 0, 1, 1], [], []>} : vector<1x128xf32>, vector<128x512xf32>, vector<1x512xf32> -> vector<1x512xf32>
    %193 = arith.addf %190, %192 : vector<1x512xf32>
    %194 = vector.extract_strided_slice %193 {offsets = [0, 0], sizes = [1, 128], strides = [1, 1]} : vector<1x512xf32> to vector<1x128xf32>
    %195 = arith.negf %194 : vector<1x128xf32>
    %196 = math.exp %195 : vector<1x128xf32>
    %cst_55 = arith.constant 1.000000e+00 : f32
    %197 = vector.broadcast %cst_55 : f32 to vector<1x128xf32>
    %198 = arith.addf %197, %196 : vector<1x128xf32>
    %199 = arith.divf %197, %198 : vector<1x128xf32>
    %200 = vector.extract_strided_slice %193 {offsets = [0, 128], sizes = [1, 128], strides = [1, 1]} : vector<1x512xf32> to vector<1x128xf32>
    %201 = arith.negf %200 : vector<1x128xf32>
    %202 = math.exp %201 : vector<1x128xf32>
    %cst_56 = arith.constant 1.000000e+00 : f32
    %203 = vector.broadcast %cst_56 : f32 to vector<1x128xf32>
    %204 = arith.addf %203, %202 : vector<1x128xf32>
    %205 = arith.divf %203, %204 : vector<1x128xf32>
    %206 = vector.extract_strided_slice %193 {offsets = [0, 256], sizes = [1, 128], strides = [1, 1]} : vector<1x512xf32> to vector<1x128xf32>
    %207 = math.tanh %206 : vector<1x128xf32>
    %208 = vector.extract_strided_slice %193 {offsets = [0, 384], sizes = [1, 128], strides = [1, 1]} : vector<1x512xf32> to vector<1x128xf32>
    %209 = arith.negf %208 : vector<1x128xf32>
    %210 = math.exp %209 : vector<1x128xf32>
    %cst_57 = arith.constant 1.000000e+00 : f32
    %211 = vector.broadcast %cst_57 : f32 to vector<1x128xf32>
    %212 = arith.addf %211, %210 : vector<1x128xf32>
    %213 = arith.divf %211, %212 : vector<1x128xf32>
    %214 = arith.mulf %205, %186 : vector<1x128xf32>
    %215 = arith.mulf %199, %207 : vector<1x128xf32>
    %216 = arith.addf %214, %215 : vector<1x128xf32>
    %217 = math.tanh %216 : vector<1x128xf32>
    %218 = arith.mulf %213, %217 : vector<1x128xf32>
    %c7_i32 = arith.constant 7 : i32
    %219 = arith.index_cast %c7_i32 : i32 to index
    %c0_58 = arith.constant 0 : index
    %220 = vector.load %arg7[%219, %c0_58] : memref<8x512xf32, #tpu.memory_space<vmem>>, vector<1x512xf32>
    %c0_59 = arith.constant 0 : index
    %c0_60 = arith.constant 0 : index
    %221 = vector.load %arg2[%c0_59, %c0_60] : memref<128x512xf32, #tpu.memory_space<vmem>>, vector<128x512xf32>
    %cst_61 = arith.constant dense<0.000000e+00> : vector<1x512xf32>
    %222 = tpu.matmul %218, %221, %cst_61 {dimension_numbers = #tpu.dot_dimension_numbers<[1], [0], [0], [1], [0, 0, 1, 1], [], []>} : vector<1x128xf32>, vector<128x512xf32>, vector<1x512xf32> -> vector<1x512xf32>
    %223 = arith.addf %220, %222 : vector<1x512xf32>
    %224 = vector.extract_strided_slice %223 {offsets = [0, 0], sizes = [1, 128], strides = [1, 1]} : vector<1x512xf32> to vector<1x128xf32>
    %225 = arith.negf %224 : vector<1x128xf32>
    %226 = math.exp %225 : vector<1x128xf32>
    %cst_62 = arith.constant 1.000000e+00 : f32
    %227 = vector.broadcast %cst_62 : f32 to vector<1x128xf32>
    %228 = arith.addf %227, %226 : vector<1x128xf32>
    %229 = arith.divf %227, %228 : vector<1x128xf32>
    %230 = vector.extract_strided_slice %223 {offsets = [0, 128], sizes = [1, 128], strides = [1, 1]} : vector<1x512xf32> to vector<1x128xf32>
    %231 = arith.negf %230 : vector<1x128xf32>
    %232 = math.exp %231 : vector<1x128xf32>
    %cst_63 = arith.constant 1.000000e+00 : f32
    %233 = vector.broadcast %cst_63 : f32 to vector<1x128xf32>
    %234 = arith.addf %233, %232 : vector<1x128xf32>
    %235 = arith.divf %233, %234 : vector<1x128xf32>
    %236 = vector.extract_strided_slice %223 {offsets = [0, 256], sizes = [1, 128], strides = [1, 1]} : vector<1x512xf32> to vector<1x128xf32>
    %237 = math.tanh %236 : vector<1x128xf32>
    %238 = vector.extract_strided_slice %223 {offsets = [0, 384], sizes = [1, 128], strides = [1, 1]} : vector<1x512xf32> to vector<1x128xf32>
    %239 = arith.negf %238 : vector<1x128xf32>
    %240 = math.exp %239 : vector<1x128xf32>
    %cst_64 = arith.constant 1.000000e+00 : f32
    %241 = vector.broadcast %cst_64 : f32 to vector<1x128xf32>
    %242 = arith.addf %241, %240 : vector<1x128xf32>
    %243 = arith.divf %241, %242 : vector<1x128xf32>
    %244 = arith.mulf %235, %216 : vector<1x128xf32>
    %245 = arith.mulf %229, %237 : vector<1x128xf32>
    %246 = arith.addf %244, %245 : vector<1x128xf32>
    %247 = math.tanh %246 : vector<1x128xf32>
    %248 = arith.mulf %243, %247 : vector<1x128xf32>
    %c8_i32 = arith.constant 8 : i32
    %c0_65 = arith.constant 0 : index
    %c0_66 = arith.constant 0 : index
    %249 = vector.load %arg4[%c0_65, %c0_66] : memref<128x128xf32, #tpu.memory_space<vmem>>, vector<128x128xf32>
    %cst_67 = arith.constant dense<0.000000e+00> : vector<1x128xf32>
    %250 = tpu.matmul %248, %249, %cst_67 {dimension_numbers = #tpu.dot_dimension_numbers<[1], [0], [0], [1], [0, 0, 1, 1], [], []>} : vector<1x128xf32>, vector<128x128xf32>, vector<1x128xf32> -> vector<1x128xf32>
    %c0_68 = arith.constant 0 : index
    %c0_69 = arith.constant 0 : index
    %251 = vector.load %arg5[%c0_68, %c0_69] : memref<1x128xf32, #tpu.memory_space<vmem>>, vector<1x128xf32>
    %252 = arith.addf %250, %251 : vector<1x128xf32>
    %c0_70 = arith.constant 0 : index
    %c0_71 = arith.constant 0 : index
    %253 = vector.load %arg6[%c0_70, %c0_71] : memref<1x128xf32, #tpu.memory_space<vmem>>, vector<1x128xf32>
    tpu.vector_store %arg6[%c0_70, %c0_71], %252 {strides = array<i32>} : memref<1x128xf32, #tpu.memory_space<vmem>>, vector<1x128xf32>,
    return
  }
}

</mosaic_0001>

<bundles_post_ra>
// kernel: tpu_custom_call.1
= control target key start
LH: loop header
LB: loop body
LE: loop exit
PB: predicated region body
PF: predicated region fallthrough
CT: control target
= control target key end

     0   :  { %11 = vsyncpa [#allocation4], 0  ;;  %s3417_s0 = inlined_call_operand.vmem [shape: f32[8,4], index: 0, kind: input, shape index: {}]   ;;  %s3418_s1 = inlined_call_operand.hbm [shape: f32[4,512], index: 1, kind: input, shape index: {}]   ;;  %s3419_s2 = inlined_call_operand.hbm [shape: f32[128,512], index: 2, kind: input, shape index: {}]   ;;  %s3420_s3 = inlined_call_operand.vmem [shape: f32[1,512], index: 3, kind: input, shape index: {}]   ;;  %s3421_s4 = inlined_call_operand.hbm [shape: f32[128,128], index: 4, kind: input, shape index: {}]   ;;  %s3422_s5 = inlined_call_operand.vmem [shape: f32[1,128], index: 5, kind: input, shape index: {}]   ;;  %s3423_s6 = inlined_call_operand.hbm [shape: f32[1,128], index: 6, kind: output, shape index: {}]  }
   0x1   :  { %12 = vsyncpa [#allocation7], 0 }
   0x2   :  { %13 = vsyncpa [#allocation5], 0  ;;  %s2912_s21 = smov [#allocation6]   ;;  %s2818_s25 = scalar_lea.hbm %s3419_s2, 8192 }
   0x3   :  { %s31_s22 = sshll.u32 %s2912_s21, 4  ;;  %p2819_p0 = scmp.ne.s32.totalorder %s3419_s2, %s2818_s25  ;;  %s32_s22 = int_to_ptr.vmem [resolvable:$true] %s31_s22 }
   0x4   :  { %p2822_p1 = scmp.lt.u32.totalorder %s2818_s25, %s3419_s2 }
   0x6   :  { %p2824_p2 = pnand %p2822_p1, %p2819_p0 }
   0x8   :  { %2827 = shalt.err (!%p2824_p2)
}
   0x9   :  { %s2828_s30 = scalar_lea.vmem %s32_s22, 8192  ;;  %p2833_p4 = scmp.lt.s32.totalorder %s32_s22, %s32_s22 }
   0xa   :  { %p2829_p3 = scmp.ne.s32.totalorder %s32_s22, %s2828_s30  ;;  %p2834_p5 = scmp.lt.s32.totalorder %s2828_s30, %s2828_s30 }
   0xc   :  { %p2835_p6 = por %p2834_p5, %p2833_p4 }
   0xe   :  { %p2836_p7 = pnand %p2835_p6, %p2829_p3 }
  0x10   :  { %2839 = shalt.err (!%p2836_p7)
}
  0x11   :  { %s2913_s7 = smov 512   ;;  %s2914_s8 = smov 32  }
  0x12   :  { %37 = dma.hbm_to_vmem [thread:$0]  %s3419_s2, 8192, %s32_s22, [#allocation7], %s2913_s7, %s2913_s7, %s2914_s8  }
  0x13   :  { %s2915_s11 = smov [#allocation3]   ;;  %s2916_s13 = smov [#allocation8]  }
  0x14   :  { %s22_s12 = sshll.u32 %s2915_s11, 4  ;;  %s45_s14 = sshll.u32 %s2916_s13, 4  ;;  %s23_s12 = int_to_ptr.vmem [resolvable:$true] %s22_s12  ;;  %s46_s14 = int_to_ptr.vmem [resolvable:$true] %s45_s14 }
  0x15   :  { %s2840_s17 = scalar_lea.hbm %s3418_s1, 256 }
  0x16   :  { %p2841_p8 = scmp.ne.s32.totalorder %s3418_s1, %s2840_s17  ;;  %p2844_p9 = scmp.lt.u32.totalorder %s2840_s17, %s3418_s1 }
  0x18   :  { %p2846_p10 = pnand %p2844_p9, %p2841_p8 }
  0x1a   :  { %2849 = shalt.err (!%p2846_p10)
}
  0x1b   :  { %s2850_s2 = scalar_lea.vmem %s23_s12, 256  ;;  %p2855_p12 = scmp.lt.s32.totalorder %s23_s12, %s23_s12 }
  0x1c   :  { %p2851_p11 = scmp.ne.s32.totalorder %s23_s12, %s2850_s2  ;;  %p2856_p13 = scmp.lt.s32.totalorder %s2850_s2, %s2850_s2 }
  0x1e   :  { %p2857_p0 = por %p2856_p13, %p2855_p12 }
  0x20   :  { %p2858_p1 = pnand %p2857_p0, %p2851_p11 }
  0x22   :  { %2861 = shalt.err (!%p2858_p1)
}
  0x23   :  { %25 = dma.hbm_to_vmem [thread:$0]  %s3418_s1, 256, %s23_s12, [#allocation4]  }
  0x24   :  { %s2862_s26 = scalar_lea.hbm %s3421_s4, 2048 }
  0x25   :  { %p2863_p2 = scmp.ne.s32.totalorder %s3421_s4, %s2862_s26  ;;  %p2866_p3 = scmp.lt.u32.totalorder %s2862_s26, %s3421_s4 }
  0x27   :  { %p2868_p4 = pnand %p2866_p3, %p2863_p2 }
  0x29   :  { %2871 = shalt.err (!%p2868_p4)
}
  0x2a   :  { %s2872_s7 = scalar_lea.vmem %s46_s14, 2048  ;;  %p2877_p6 = scmp.lt.s32.totalorder %s46_s14, %s46_s14 }
  0x2b   :  { %p2873_p5 = scmp.ne.s32.totalorder %s46_s14, %s2872_s7  ;;  %p2878_p7 = scmp.lt.s32.totalorder %s2872_s7, %s2872_s7 }
  0x2d   :  { %p2879_p8 = por %p2878_p7, %p2877_p6 }
  0x2f   :  { %p2880_p9 = pnand %p2879_p8, %p2873_p5 }
  0x31   :  { %2883 = shalt.err (!%p2880_p9)
}
  0x32   :  { %s2917_s1 = smov 128   ;;  %s2918_s8 = smov 8  }
  0x33   :  { %51 = dma.hbm_to_vmem [thread:$0]  %s3421_s4, 2048, %s46_s14, [#allocation7], %s2917_s1, %s2917_s1, %s2918_s8  }
  0x34   :  { %2906 = dma.done.wait [#allocation4], 256  }
  0x35   :  { %2907 = vsyncadd [#allocation4], 4294967040 }
  0x36   :  { %2908 = dma.done.wait [#allocation7], 10240  }
  0x37   :  { %2909 = vsyncadd [#allocation7], 4294957056  ;;  %v2919_v0 = vmov 0.0   ;;  %v64_v1 = vld [vmem:[#allocation3] sm:$0xff]  ;;  %vm96_vm0 = vcmask 1043456   ;;  %v65_v3 = vld [vmem:[#allocation3 + $0x8] sm:$0xff] }
  0x38   :  { %169 = vmatprep.mubr.f32.mxu1 %v2919_v0  ;;  %380 = vmatprep.mubr.f32.mxu0 %v2919_v0  ;;  %v63_v2 = vld [vmem:[%s3417_s0] sm:$0xff]  ;;  %v90_v4 = vcombine.high %v64_v1, %v64_v1  ;;  %v91_v5 = vcombine.high %v65_v3, %v65_v3  ;;  %v253_v6 = vld [vmem:[#allocation6 + $0x8] sm:$0xff]  ;;  %v255_v8 = vld [vmem:[#allocation6 + $0x18] sm:$0xff]  ;;  %vm92_vm1 = vcmask 31744   ;;  %vm2922_vm2 = vmmov 0   ;;  %s2923_s14 = smov [#allocation9]  }
  0x39   :  { %v257_v7 = vld [vmem:[#allocation6 + $0x28] sm:$0xff]  ;;  %v259_v10 = vld [vmem:[#allocation6 + $0x38] sm:$0xff]  ;;  %v252_v11 = vld [vmem:[#allocation6] sm:$0xff]  ;;  %s2048_s15 = sshll.u32 %s2923_s14, 4  ;;  %s2049_s15 = int_to_ptr.vmem [resolvable:$true] %s2048_s15 }
  0x3a   :  { %v3000_v9 = vpack.c.bf16 %v257_v7, %v253_v6  ;;  %v256_v12 = vld [vmem:[#allocation6 + $0x20] sm:$0xff]  ;;  %2058 = vmatprep.subr.msk.mxu1 %vm96_vm0, %v90_v4  ;;  %v3003_v13 = vpack.c.bf16 %v259_v10, %v255_v8  ;;  %v254_v15 = vld [vmem:[#allocation6 + $0x10] sm:$0xff]  ;;  %v261_v17 = vld [vmem:[#allocation6 + $0x48] sm:$0xff]  ;;  %s2884_s16 = scalar_lea.vmem %s2049_s15, 16  ;;  %s2888_s17 = scalar_lea.vmem %s2049_s15, 32 }
  0x3b   :  { %v3005_v14 = vpack.c.bf16 %v256_v12, %v252_v11  ;;  %v258_v16 = vld [vmem:[#allocation6 + $0x30] sm:$0xff]  ;;  %2059 = vmatpush1.msk.msra.mxu1 %vm96_vm0, %v64_v1  ;;  %v265_v18 = vld [vmem:[#allocation6 + $0x68] sm:$0xff]  ;;  %v263_v19 = vld [vmem:[#allocation6 + $0x58] sm:$0xff]  ;;  %p2885_p10 = scmp.ne.s32.totalorder %s2049_s15, %s2884_s16  ;;  %p2889_p11 = scmp.lt.s32.totalorder %s2049_s15, %s2049_s15 }
  0x3c   :  { %2141 = vmatprep.subr.bf16.mxu0 %v3000_v9  ;;  %v267_v20 = vld [vmem:[#allocation6 + $0x78] sm:$0xff]  ;;  %2060 = vmatmul.mubr.msk.f32.vlgmr.msra.gmra.mrb[0].mxu1 %vm92_vm1, %v63_v2  ;;  %v3011_v21 = vpack.c.bf16 %v265_v18, %v261_v17  ;;  %v260_v22 = vld [vmem:[#allocation6 + $0x40] sm:$0xff]  ;;  %v3015_v24 = vpack.c.bf16 %v258_v16, %v254_v15  ;;  %v269_v25 = vld [vmem:[#allocation6 + $0x88] sm:$0xff]  ;;  %p2890_p12 = scmp.lt.s32.totalorder %s2888_s17, %s2884_s16 }
  0x3d   :  { %2061 = vmatprep.subr.msk.mxu1 %vm96_vm0, %v91_v5  ;;  %v264_v23 = vld [vmem:[#allocation6 + $0x60] sm:$0xff]  ;;  %240 = vmatprep.mubr.f32.mxu1 %v2919_v0  ;;  %v273_v26 = vld [vmem:[#allocation6 + $0xa8] sm:$0xff]  ;;  %v3019_v27 = vpack.c.bf16 %v267_v20, %v263_v19  ;;  %v262_v29 = vld [vmem:[#allocation6 + $0x50] sm:$0xff] }
  0x3e   :  { %2062 = vmatpush1.msk.msra.mxu1 %vm96_vm0, %v65_v3  ;;  %2143 = vmatpush1.bf16.msra.mxu0 %v3005_v14  ;;  %v3021_v28 = vpack.c.bf16 %v264_v23, %v260_v22  ;;  %v266_v30 = vld [vmem:[#allocation6 + $0x70] sm:$0xff]  ;;  %v271_v31 = vld [vmem:[#allocation6 + $0x98] sm:$0xff]  ;;  %v3024_v32 = vpack.c.bf16 %v273_v26, %v269_v25  ;;  %v268_v34 = vld [vmem:[#allocation6 + $0x80] sm:$0xff]  ;;  %p2891_p13 = por %p2890_p12, %p2889_p11 }
  0x3f   :  { %2173 = vmatprep.subr.bf16.mxu1 %v3003_v13  ;;  %2145 = vmatprep.subr.bf16.mxu0 %v3011_v21  ;;  %v275_v33 = vld [vmem:[#allocation6 + $0xb8] sm:$0xff]  ;;  %v272_v35 = vld [vmem:[#allocation6 + $0xa0] sm:$0xff]  ;;  %v277_v36 = vld [vmem:[#allocation6 + $0xc8] sm:$0xff]  ;;  %v3028_v38 = vpack.c.bf16 %v266_v30, %v262_v29 }
  0x40   :  { %2063 = vmatmul.mubr.msk.f32.vlgmr.msra.gmra.mrb[2].mxu1 %vm92_vm1, %v63_v2  ;;  %v281_v37 = vld [vmem:[#allocation6 + $0xe8] sm:$0xff]  ;;  %v3033_v39 = vpack.c.bf16 %v275_v33, %v271_v31  ;;  %v3035_v40 = vpack.c.bf16 %v272_v35, %v268_v34  ;;  %v270_v41 = vld [vmem:[#allocation6 + $0x90] sm:$0xff]  ;;  %v279_v43 = vld [vmem:[#allocation6 + $0xd8] sm:$0xff]  ;;  %p2892_p0 = pnand %p2891_p13, %p2885_p10 }
  0x41   :  { %2175 = vmatpush1.bf16.msra.mxu1 %v3015_v24  ;;  %451 = vmatprep.mubr.f32.mxu1 %v2919_v0  ;;  %v274_v42 = vld [vmem:[#allocation6 + $0xb0] sm:$0xff]  ;;  %v3038_v44 = vpack.c.bf16 %v281_v37, %v277_v36  ;;  %v283_v45 = vld [vmem:[#allocation6 + $0xf8] sm:$0xff]  ;;  %v276_v46 = vld [vmem:[#allocation6 + $0xc0] sm:$0xff] }
  0x42   :  { %2177 = vmatprep.subr.bf16.mxu1 %v3019_v27  ;;  %2147 = vmatpush1.bf16.msra.mxu0 %v3021_v28  ;;  %v280_v47 = vld [vmem:[#allocation6 + $0xe0] sm:$0xff]  ;;  %v285_v48 = vld [vmem:[#allocation6 + $0x108] sm:$0xff]  ;;  %v3041_v50 = vpack.c.bf16 %v274_v42, %v270_v41  ;;  %v3045_v51 = vpack.c.bf16 %v283_v45, %v279_v43  ;;  %v278_v53 = vld [vmem:[#allocation6 + $0xd0] sm:$0xff] }
  0x43   :  { %2149 = vmatprep.subr.bf16.mxu0 %v3024_v32  ;;  %v289_v49 = vld [vmem:[#allocation6 + $0x128] sm:$0xff]  ;;  %v3047_v52 = vpack.c.bf16 %v280_v47, %v276_v46  ;;  %v282_v54 = vld [vmem:[#allocation6 + $0xf0] sm:$0xff]  ;;  %v287_v55 = vld [vmem:[#allocation6 + $0x118] sm:$0xff] }
  0x44   :  { %v3050_v56 = vpack.c.bf16 %v289_v49, %v285_v48  ;;  %v291_v57 = vld [vmem:[#allocation6 + $0x138] sm:$0xff]  ;;  %v284_v58 = vld [vmem:[#allocation6 + $0x100] sm:$0xff]  ;;  %v293_v60 = vld [vmem:[#allocation6 + $0x148] sm:$0xff]  ;;  %v3053_v62 = vpack.c.bf16 %v282_v54, %v278_v53  ;;  %v68_v54 = vlaneseq }
  0x45   :  { %2179 = vmatpush1.bf16.msra.mxu1 %v3028_v38  ;;  %v288_v59 = vld [vmem:[#allocation6 + $0x120] sm:$0xff]  ;;  %v297_v61 = vld [vmem:[#allocation6 + $0x168] sm:$0xff]  ;;  %v3057_v63 = vpack.c.bf16 %v291_v57, %v287_v55  ;;  %v286_v2 = vld [vmem:[#allocation6 + $0x110] sm:$0xff] }
  0x46   :  { %2181 = vmatprep.subr.bf16.mxu1 %v3033_v39  ;;  %2151 = vmatpush1.bf16.msra.mxu0 %v3035_v40  ;;  %v3059_v1 = vpack.c.bf16 %v288_v59, %v284_v58  ;;  %v290_v3 = vld [vmem:[#allocation6 + $0x130] sm:$0xff]  ;;  %v295_v4 = vld [vmem:[#allocation6 + $0x158] sm:$0xff]  ;;  %v3062_v5 = vpack.c.bf16 %v297_v61, %v293_v60  ;;  %v292_v7 = vld [vmem:[#allocation6 + $0x140] sm:$0xff]  ;;  %v69_v55 = vshrl.u32 %v68_v54, 7 }
  0x47   :  { %2153 = vmatprep.subr.bf16.mxu0 %v3038_v44  ;;  %v299_v6 = vld [vmem:[#allocation6 + $0x178] sm:$0xff]  ;;  %v296_v8 = vld [vmem:[#allocation6 + $0x160] sm:$0xff]  ;;  %v301_v10 = vld [vmem:[#allocation6 + $0x188] sm:$0xff]  ;;  %v3065_v12 = vpack.c.bf16 %v290_v3, %v286_v2 }
  0x48   :  { %v305_v11 = vld [vmem:[#allocation6 + $0x1a8] sm:$0xff]  ;;  %v3069_v15 = vpack.c.bf16 %v299_v6, %v295_v4  ;;  %v3071_v16 = vpack.c.bf16 %v296_v8, %v292_v7  ;;  %v294_v17 = vld [vmem:[#allocation6 + $0x150] sm:$0xff]  ;;  %v303_v19 = vld [vmem:[#allocation6 + $0x198] sm:$0xff]  ;;  %v70_v57 = vsub.s32 0, %v69_v55  ;;  %v74_v59 = vsub.s32 1, %v69_v55 }
  0x49   :  { %2183 = vmatpush1.bf16.msra.mxu1 %v3041_v50  ;;  %v298_v18 = vld [vmem:[#allocation6 + $0x170] sm:$0xff]  ;;  %v3074_v20 = vpack.c.bf16 %v305_v11, %v301_v10  ;;  %v307_v22 = vld [vmem:[#allocation6 + $0x1b8] sm:$0xff]  ;;  %v300_v23 = vld [vmem:[#allocation6 + $0x180] sm:$0xff]  ;;  %v78_v61 = vsub.s32 2, %v69_v55  ;;  %v82_v3 = vsub.s32 3, %v69_v55 }
  0x4a   :  { %2185 = vmatprep.subr.bf16.mxu1 %v3045_v51  ;;  %2155 = vmatpush1.bf16.msra.mxu0 %v3047_v52  ;;  %v304_v25 = vld [vmem:[#allocation6 + $0x1a0] sm:$0xff]  ;;  %v309_v26 = vld [vmem:[#allocation6 + $0x1c8] sm:$0xff]  ;;  %v3077_v30 = vpack.c.bf16 %v298_v18, %v294_v17  ;;  %v3081_v31 = vpack.c.bf16 %v307_v22, %v303_v19  ;;  %v302_v34 = vld [vmem:[#allocation6 + $0x190] sm:$0xff] }
  0x4b   :  { %2157 = vmatprep.subr.bf16.mxu0 %v3050_v56  ;;  %v313_v29 = vld [vmem:[#allocation6 + $0x1e8] sm:$0xff]  ;;  %v3083_v33 = vpack.c.bf16 %v304_v25, %v300_v23  ;;  %v306_v35 = vld [vmem:[#allocation6 + $0x1b0] sm:$0xff]  ;;  %v311_v36 = vld [vmem:[#allocation6 + $0x1d8] sm:$0xff]  ;;  %v2920_v23 = vmov 1966171168  }
  0x4c   :  { %v3086_v37 = vpack.c.bf16 %v313_v29, %v309_v26  ;;  %v315_v41 = vld [vmem:[#allocation6 + $0x1f8] sm:$0xff]  ;;  %v308_v42 = vld [vmem:[#allocation6 + $0x1c0] sm:$0xff]  ;;  %v3089_v45 = vpack.c.bf16 %v306_v35, %v302_v34  ;;  %v310_v48 = vld [vmem:[#allocation6 + $0x1d0] sm:$0xff]  ;;  %v465_v25 = vunpack.c.l.s4 %v2920_v23 }
  0x4d   :  { %2187 = vmatpush1.bf16.msra.mxu1 %v3053_v62  ;;  %v312_v43 = vld [vmem:[#allocation6 + $0x1e0] sm:$0xff]  ;;  %v3093_v46 = vpack.c.bf16 %v315_v41, %v311_v36  ;;  %v314_v49 = vld [vmem:[#allocation6 + $0x1f0] sm:$0xff] }
  0x4e   :  { %2189 = vmatprep.subr.bf16.mxu1 %v3057_v63  ;;  %2159 = vmatpush1.bf16.msra.mxu0 %v3059_v1  ;;  %v3095_v47 = vpack.c.bf16 %v312_v43, %v308_v42  ;;  %v3099_v53 = vpack.c.bf16 %v314_v49, %v310_v48  ;;  %v66_v58 = vld [vmem:[%s3420_s3] sm:$0xf]  ;;  %v466_v26 = vunpack.c.0.s8 %v465_v25 }
  0x4f   :  { %2161 = vmatprep.subr.bf16.mxu0 %v3062_v5  ;;  %v71_v60 = vrot.slane %v66_v58, %v70_v57  ;;  %v75_v2 = vrot.slane %v66_v58, %v74_v59  ;;  %v79_v8 = vrot.slane %v66_v58, %v78_v61  ;;  %v83_v11 = vrot.slane %v66_v58, %v82_v3 }
  0x50   :  { %v3145_v34 = vsub.s32 %v466_v26, %v69_v55 }
  0x51   :  { %2191 = vmatpush1.bf16.msra.mxu1 %v3065_v12 }
  0x52   :  { %2193 = vmatprep.subr.bf16.mxu1 %v3069_v15  ;;  %2163 = vmatpush1.bf16.msra.mxu0 %v3071_v16 }
  0x53   :  { %2165 = vmatprep.subr.bf16.mxu0 %v3074_v20 }
  0x55   :  { %2195 = vmatpush1.bf16.msra.mxu1 %v3077_v30 }
  0x56   :  { %2197 = vmatprep.subr.bf16.mxu1 %v3081_v31  ;;  %2167 = vmatpush1.bf16.msra.mxu0 %v3083_v33 }
  0x57   :  { %2169 = vmatprep.subr.bf16.mxu0 %v3086_v37 }
  0x59   :  { %2199 = vmatpush1.bf16.msra.mxu1 %v3089_v45 }
  0x5a   :  { %2201 = vmatprep.subr.bf16.mxu1 %v3093_v46  ;;  %2171 = vmatpush1.bf16.msra.mxu0 %v3095_v47 }
  0x5b   :  { %2205 = vmatprep.subr.bf16.mxu0 %v3000_v9 }
  0x5d   :  { %2203 = vmatpush1.bf16.msra.mxu1 %v3099_v53  ;;  %381 = vmatmul.mubr.f32.vlgmr.msra.gmra.mrb[0].mxu0 %v2919_v0 }
  0x5e   :  { %2237 = vmatprep.subr.bf16.mxu1 %v3003_v13  ;;  %2207 = vmatpush1.bf16.msra.mxu0 %v3005_v14 }
  0x5f   :  { %2209 = vmatprep.subr.bf16.mxu0 %v3011_v21  ;;  %585 = vmatprep.mubr.f32.mxu0 %v2919_v0 }
  0x60   :  { %452 = vmatmul.mubr.f32.vlgmr.msra.gmra.mrb[4].mxu1 %v2919_v0 }
  0x61   :  { %2239 = vmatpush1.bf16.msra.mxu1 %v3015_v24  ;;  %656 = vmatprep.mubr.f32.mxu1 %v2919_v0 }
  0x62   :  { %2241 = vmatprep.subr.bf16.mxu1 %v3019_v27  ;;  %2211 = vmatpush1.bf16.msra.mxu0 %v3021_v28 }
  0x63   :  { %2213 = vmatprep.subr.bf16.mxu0 %v3024_v32 }
  0x65   :  { %2243 = vmatpush1.bf16.msra.mxu1 %v3028_v38 }
  0x66   :  { %2245 = vmatprep.subr.bf16.mxu1 %v3033_v39  ;;  %2215 = vmatpush1.bf16.msra.mxu0 %v3035_v40 }
  0x67   :  { %2217 = vmatprep.subr.bf16.mxu0 %v3038_v44 }
  0x69   :  { %2247 = vmatpush1.bf16.msra.mxu1 %v3041_v50 }
  0x6a   :  { %2249 = vmatprep.subr.bf16.mxu1 %v3045_v51  ;;  %2219 = vmatpush1.bf16.msra.mxu0 %v3047_v52 }
  0x6b   :  { %2221 = vmatprep.subr.bf16.mxu0 %v3050_v56 }
  0x6d   :  { %2251 = vmatpush1.bf16.msra.mxu1 %v3053_v62 }
  0x6e   :  { %2253 = vmatprep.subr.bf16.mxu1 %v3057_v63  ;;  %2223 = vmatpush1.bf16.msra.mxu0 %v3059_v1 }
  0x6f   :  { %2225 = vmatprep.subr.bf16.mxu0 %v3062_v5 }
  0x71   :  { %2255 = vmatpush1.bf16.msra.mxu1 %v3065_v12 }
  0x72   :  { %2257 = vmatprep.subr.bf16.mxu1 %v3069_v15  ;;  %2227 = vmatpush1.bf16.msra.mxu0 %v3071_v16 }
  0x73   :  { %2229 = vmatprep.subr.bf16.mxu0 %v3074_v20 }
  0x75   :  { %2259 = vmatpush1.bf16.msra.mxu1 %v3077_v30 }
  0x76   :  { %2261 = vmatprep.subr.bf16.mxu1 %v3081_v31  ;;  %2231 = vmatpush1.bf16.msra.mxu0 %v3083_v33 }
  0x77   :  { %2233 = vmatprep.subr.bf16.mxu0 %v3086_v37 }
  0x79   :  { %2263 = vmatpush1.bf16.msra.mxu1 %v3089_v45 }
  0x7a   :  { %2265 = vmatprep.subr.bf16.mxu1 %v3093_v46  ;;  %2235 = vmatpush1.bf16.msra.mxu0 %v3095_v47 }
  0x7b   :  { %2269 = vmatprep.subr.bf16.mxu0 %v3000_v9 }
  0x7d   :  { %2267 = vmatpush1.bf16.msra.mxu1 %v3099_v53 }
  0x7e   :  { %2301 = vmatprep.subr.bf16.mxu1 %v3003_v13 }
 0x10f   :  { %v171_v4 = vpop.f32.mrb[0].mxu1 }
 0x110   :  { %v172_v6 = vadd.f32 %v171_v4, %v71_v60  ;;  %v173_v7 = vpop.f32.mrb[1].mxu1 }
 0x111   :  { %v174_v10 = vadd.f32 %v173_v7, %v75_v2 }
 0x112   :  { %247 = vst [vmem:[#allocation2] sm:$0xff] %v172_v6 }
 0x113   :  { %248 = vst [vmem:[#allocation2 + $0x8] sm:$0xff] %v174_v10  ;;  %v242_v17 = vpop.f32.mrb[2].mxu1 }
 0x114   :  { %v243_v18 = vadd.f32 %v242_v17, %v79_v8  ;;  %v244_v19 = vpop.f32.mrb[3].mxu1 }
 0x115   :  { %v245_v22 = vadd.f32 %v244_v19, %v83_v11 }
 0x116   :  { %249 = vst [vmem:[#allocation2 + $0x10] sm:$0xff] %v243_v18 }
 0x117   :  { %250 = vst [vmem:[#allocation2 + $0x18] sm:$0xff] %v245_v22 }
 0x11e   :  { %v251_v58 = vld [vmem:[#allocation2] ss:$8 sm:$0xf] }
 0x130   :  { %v382_v29 = vpop.f32.mrb[0].mxu0 }
 0x131   :  { %v384_v35 = vpop.f32.mrb[1].mxu0 }
 0x132   :  { %v462_v36 = vcombine.low %v382_v29, %v384_v35 }
 0x133   :  { %v453_v41 = vpop.f32.mrb[4].mxu1 }
 0x134   :  { %v455_v42 = vpop.f32.mrb[5].mxu1  ;;  %v470_v43 = vrot.slane %v462_v36, %v3145_v34 }
 0x135   :  { %v463_v48 = vcombine.low %v453_v41, %v455_v42 }
 0x137   :  { %v477_v49 = vrot.slane %v463_v48, %v3145_v34 }
 0x139   :  { %v478_v54 = vcombine.low %v470_v43, %v477_v49 }
 0x13b   :  { %v485_v57 = vrot.slane %v478_v54, %v3145_v34 }
 0x13d   :  { %v487_v59 = vadd.f32 %v485_v57, %v251_v58 }
 0x13f   :  { %v2064_v60 = vmul.f32 -1.442695, %v487_v59  ;;  %v495_v61 = vrot.slane %v487_v59, 1  ;;  %v506_v55 = vrot.slane %v487_v59, 3  ;;  %v503_v6 = vrot.slane %v487_v59, 2 }
 0x141   :  { %2690 = vpow2.f32 %v2064_v60  ;;  %v2065_v2 = vmul.f32 -1.442695, %v495_v61  ;;  %v2066_v3 = vmul.f32 -1.442695, %v506_v55 }
 0x142   :  { %v520_v61 = vld [vmem:[#allocation2 + $0x1] ss:$8 sm:$0xf] }
 0x143   :  { %2692 = vpow2.f32 %v2065_v2 }
 0x144   :  { %2694 = vpow2.f32 %v2066_v3 }
 0x14b   :  { %v2691_v4 = vpop.eup %2690 }
 0x14c   :  { %v491_v7 = vadd.f32 1.0, %v2691_v4 }
 0x14d   :  { %v2693_v8 = vpop.eup %2692 }
 0x14e   :  { %2696 = vrcp.f32 %v491_v7  ;;  %v500_v10 = vadd.f32 1.0, %v2693_v8  ;;  %v2695_v11 = vpop.eup %2694 }
 0x14f   :  { %2698 = vtanh.f32 %v503_v6  ;;  %v511_v22 = vadd.f32 1.0, %v2695_v11 }
 0x150   :  { %2700 = vrcp.f32 %v500_v10 }
 0x151   :  { %2702 = vrcp.f32 %v511_v22 }
 0x158   :  { %v2697_v17 = vpop.eup %2696 }
 0x159   :  { %v2699_v18 = vpop.eup %2698 }
 0x15a   :  { %v2701_v19 = vpop.eup %2700  ;;  %v515_v25 = vmul.f32 %v2699_v18, %v2697_v17 }
 0x15b   :  { %v514_v23 = vmul.f32 0.0, %v2701_v19  ;;  %v2703_v29 = vpop.eup %2702 }
 0x15d   :  { %v3150_v26 = vadd.f32 %v515_v25, %v514_v23 }
 0x15f   :  { %2704 = vtanh.f32 %v3150_v26 }
 0x169   :  { %v2705_v35 = vpop.eup %2704 }
 0x16a   :  { %v518_v36 = vmul.f32 %v2705_v35, %v2703_v29 }
 0x16c   :  { %586 = vmatmul.mubr.f32.vlgmr.msra.gmra.mrb[2].mxu0 %v518_v36  ;;  %657 = vmatmul.mubr.f32.vlgmr.msra.gmra.mrb[6].mxu1 %v518_v36 }
 0x16d   :  { %2271 = vmatpush1.bf16.msra.mxu0 %v3005_v14  ;;  %2303 = vmatpush1.bf16.msra.mxu1 %v3015_v24 }
 0x16e   :  { %2273 = vmatprep.subr.bf16.mxu0 %v3011_v21  ;;  %2305 = vmatprep.subr.bf16.mxu1 %v3019_v27 }
 0x16f   :  { %790 = vmatprep.mubr.f32.mxu0 %v2919_v0  ;;  %861 = vmatprep.mubr.f32.mxu1 %v2919_v0 }
 0x171   :  { %2275 = vmatpush1.bf16.msra.mxu0 %v3021_v28  ;;  %2307 = vmatpush1.bf16.msra.mxu1 %v3028_v38 }
 0x172   :  { %2277 = vmatprep.subr.bf16.mxu0 %v3024_v32  ;;  %2309 = vmatprep.subr.bf16.mxu1 %v3033_v39 }
 0x175   :  { %2279 = vmatpush1.bf16.msra.mxu0 %v3035_v40  ;;  %2311 = vmatpush1.bf16.msra.mxu1 %v3041_v50 }
 0x176   :  { %2281 = vmatprep.subr.bf16.mxu0 %v3038_v44  ;;  %2313 = vmatprep.subr.bf16.mxu1 %v3045_v51 }
 0x179   :  { %2283 = vmatpush1.bf16.msra.mxu0 %v3047_v52  ;;  %2315 = vmatpush1.bf16.msra.mxu1 %v3053_v62 }
 0x17a   :  { %2285 = vmatprep.subr.bf16.mxu0 %v3050_v56  ;;  %2317 = vmatprep.subr.bf16.mxu1 %v3057_v63 }
 0x17d   :  { %2287 = vmatpush1.bf16.msra.mxu0 %v3059_v1  ;;  %2319 = vmatpush1.bf16.msra.mxu1 %v3065_v12 }
 0x17e   :  { %2289 = vmatprep.subr.bf16.mxu0 %v3062_v5  ;;  %2321 = vmatprep.subr.bf16.mxu1 %v3069_v15 }
 0x181   :  { %2291 = vmatpush1.bf16.msra.mxu0 %v3071_v16  ;;  %2323 = vmatpush1.bf16.msra.mxu1 %v3077_v30 }
 0x182   :  { %2293 = vmatprep.subr.bf16.mxu0 %v3074_v20  ;;  %2325 = vmatprep.subr.bf16.mxu1 %v3081_v31 }
 0x185   :  { %2295 = vmatpush1.bf16.msra.mxu0 %v3083_v33  ;;  %2327 = vmatpush1.bf16.msra.mxu1 %v3089_v45 }
 0x186   :  { %2297 = vmatprep.subr.bf16.mxu0 %v3086_v37  ;;  %2329 = vmatprep.subr.bf16.mxu1 %v3093_v46 }
 0x189   :  { %2299 = vmatpush1.bf16.msra.mxu0 %v3095_v47  ;;  %2331 = vmatpush1.bf16.msra.mxu1 %v3099_v53 }
 0x18a   :  { %2333 = vmatprep.subr.bf16.mxu0 %v3000_v9  ;;  %2365 = vmatprep.subr.bf16.mxu1 %v3003_v13 }
 0x23f   :  { %v587_v41 = vpop.f32.mrb[2].mxu0  ;;  %v658_v42 = vpop.f32.mrb[6].mxu1 }
 0x240   :  { %v589_v43 = vpop.f32.mrb[3].mxu0  ;;  %v660_v48 = vpop.f32.mrb[7].mxu1 }
 0x241   :  { %v667_v49 = vcombine.low %v587_v41, %v589_v43  ;;  %v668_v54 = vcombine.low %v658_v42, %v660_v48 }
 0x243   :  { %v675_v57 = vrot.slane %v667_v49, %v3145_v34  ;;  %v682_v58 = vrot.slane %v668_v54, %v3145_v34 }
 0x245   :  { %v683_v59 = vcombine.low %v675_v57, %v682_v58 }
 0x247   :  { %v690_v60 = vrot.slane %v683_v59, %v3145_v34 }
 0x249   :  { %v692_v2 = vadd.f32 %v690_v60, %v520_v61 }
 0x24b   :  { %v2067_v55 = vmul.f32 -1.442695, %v692_v2  ;;  %v700_v3 = vrot.slane %v692_v2, 1  ;;  %v711_v6 = vrot.slane %v692_v2, 3  ;;  %v708_v10 = vrot.slane %v692_v2, 2 }
 0x24d   :  { %2706 = vpow2.f32 %v2067_v55  ;;  %v2068_v4 = vmul.f32 -1.442695, %v700_v3  ;;  %v2069_v7 = vmul.f32 -1.442695, %v711_v6 }
 0x24e   :  { %v725_v3 = vld [vmem:[#allocation2 + $0x2] ss:$8 sm:$0xf] }
 0x24f   :  { %2708 = vpow2.f32 %v2068_v4 }
 0x250   :  { %2710 = vpow2.f32 %v2069_v7 }
 0x257   :  { %v2707_v8 = vpop.eup %2706 }
 0x258   :  { %v696_v11 = vadd.f32 1.0, %v2707_v8 }
 0x259   :  { %v2709_v17 = vpop.eup %2708 }
 0x25a   :  { %2712 = vrcp.f32 %v696_v11  ;;  %v705_v18 = vadd.f32 1.0, %v2709_v17  ;;  %v2711_v19 = vpop.eup %2710 }
 0x25b   :  { %2714 = vtanh.f32 %v708_v10  ;;  %v716_v29 = vadd.f32 1.0, %v2711_v19 }
 0x25c   :  { %2716 = vrcp.f32 %v705_v18 }
 0x25d   :  { %2718 = vrcp.f32 %v716_v29 }
 0x264   :  { %v2713_v22 = vpop.eup %2712 }
 0x265   :  { %v2715_v23 = vpop.eup %2714 }
 0x266   :  { %v2717_v25 = vpop.eup %2716  ;;  %v720_v36 = vmul.f32 %v2715_v23, %v2713_v22 }
 0x267   :  { %v719_v35 = vmul.f32 %v2717_v25, %v3150_v26  ;;  %v2719_v42 = vpop.eup %2718 }
 0x269   :  { %v3191_v41 = vadd.f32 %v720_v36, %v719_v35 }
 0x26b   :  { %2720 = vtanh.f32 %v3191_v41 }
 0x275   :  { %v2721_v43 = vpop.eup %2720 }
 0x276   :  { %v723_v48 = vmul.f32 %v2721_v43, %v2719_v42 }
 0x278   :  { %791 = vmatmul.mubr.f32.vlgmr.msra.gmra.mrb[4].mxu0 %v723_v48  ;;  %862 = vmatmul.mubr.f32.vlgmr.msra.gmra.mrb[8].mxu1 %v723_v48 }
 0x279   :  { %2335 = vmatpush1.bf16.msra.mxu0 %v3005_v14  ;;  %2367 = vmatpush1.bf16.msra.mxu1 %v3015_v24 }
 0x27a   :  { %2337 = vmatprep.subr.bf16.mxu0 %v3011_v21  ;;  %2369 = vmatprep.subr.bf16.mxu1 %v3019_v27 }
 0x27b   :  { %995 = vmatprep.mubr.f32.mxu0 %v2919_v0  ;;  %1066 = vmatprep.mubr.f32.mxu1 %v2919_v0 }
 0x27d   :  { %2339 = vmatpush1.bf16.msra.mxu0 %v3021_v28  ;;  %2371 = vmatpush1.bf16.msra.mxu1 %v3028_v38 }
 0x27e   :  { %2341 = vmatprep.subr.bf16.mxu0 %v3024_v32  ;;  %2373 = vmatprep.subr.bf16.mxu1 %v3033_v39 }
 0x281   :  { %2343 = vmatpush1.bf16.msra.mxu0 %v3035_v40  ;;  %2375 = vmatpush1.bf16.msra.mxu1 %v3041_v50 }
 0x282   :  { %2345 = vmatprep.subr.bf16.mxu0 %v3038_v44  ;;  %2377 = vmatprep.subr.bf16.mxu1 %v3045_v51 }
 0x285   :  { %2347 = vmatpush1.bf16.msra.mxu0 %v3047_v52  ;;  %2379 = vmatpush1.bf16.msra.mxu1 %v3053_v62 }
 0x286   :  { %2349 = vmatprep.subr.bf16.mxu0 %v3050_v56  ;;  %2381 = vmatprep.subr.bf16.mxu1 %v3057_v63 }
 0x289   :  { %2351 = vmatpush1.bf16.msra.mxu0 %v3059_v1  ;;  %2383 = vmatpush1.bf16.msra.mxu1 %v3065_v12 }
 0x28a   :  { %2353 = vmatprep.subr.bf16.mxu0 %v3062_v5  ;;  %2385 = vmatprep.subr.bf16.mxu1 %v3069_v15 }
 0x28d   :  { %2355 = vmatpush1.bf16.msra.mxu0 %v3071_v16  ;;  %2387 = vmatpush1.bf16.msra.mxu1 %v3077_v30 }
 0x28e   :  { %2357 = vmatprep.subr.bf16.mxu0 %v3074_v20  ;;  %2389 = vmatprep.subr.bf16.mxu1 %v3081_v31 }
 0x291   :  { %2359 = vmatpush1.bf16.msra.mxu0 %v3083_v33  ;;  %2391 = vmatpush1.bf16.msra.mxu1 %v3089_v45 }
 0x292   :  { %2361 = vmatprep.subr.bf16.mxu0 %v3086_v37  ;;  %2393 = vmatprep.subr.bf16.mxu1 %v3093_v46 }
 0x295   :  { %2363 = vmatpush1.bf16.msra.mxu0 %v3095_v47  ;;  %2395 = vmatpush1.bf16.msra.mxu1 %v3099_v53 }
 0x296   :  { %2397 = vmatprep.subr.bf16.mxu0 %v3000_v9  ;;  %2429 = vmatprep.subr.bf16.mxu1 %v3003_v13 }
 0x34b   :  { %v792_v26 = vpop.f32.mrb[4].mxu0  ;;  %v863_v49 = vpop.f32.mrb[8].mxu1 }
 0x34c   :  { %v794_v54 = vpop.f32.mrb[5].mxu0  ;;  %v865_v57 = vpop.f32.mrb[9].mxu1 }
 0x34d   :  { %v872_v58 = vcombine.low %v792_v26, %v794_v54  ;;  %v873_v59 = vcombine.low %v863_v49, %v865_v57 }
 0x34f   :  { %v880_v60 = vrot.slane %v872_v58, %v3145_v34  ;;  %v887_v61 = vrot.slane %v873_v59, %v3145_v34 }
 0x351   :  { %v888_v2 = vcombine.low %v880_v60, %v887_v61 }
 0x353   :  { %v895_v55 = vrot.slane %v888_v2, %v3145_v34 }
 0x355   :  { %v897_v4 = vadd.f32 %v895_v55, %v725_v3 }
 0x357   :  { %v2070_v6 = vmul.f32 -1.442695, %v897_v4  ;;  %v905_v7 = vrot.slane %v897_v4, 1  ;;  %v916_v10 = vrot.slane %v897_v4, 3  ;;  %v913_v18 = vrot.slane %v897_v4, 2 }
 0x359   :  { %2722 = vpow2.f32 %v2070_v6  ;;  %v2071_v8 = vmul.f32 -1.442695, %v905_v7  ;;  %v2072_v11 = vmul.f32 -1.442695, %v916_v10 }
 0x35a   :  { %v930_v7 = vld [vmem:[#allocation2 + $0x3] ss:$8 sm:$0xf] }
 0x35b   :  { %2724 = vpow2.f32 %v2071_v8 }
 0x35c   :  { %2726 = vpow2.f32 %v2072_v11 }
 0x363   :  { %v2723_v17 = vpop.eup %2722 }
 0x364   :  { %v901_v19 = vadd.f32 1.0, %v2723_v17 }
 0x365   :  { %v2725_v22 = vpop.eup %2724 }
 0x366   :  { %2728 = vrcp.f32 %v901_v19  ;;  %v910_v23 = vadd.f32 1.0, %v2725_v22  ;;  %v2727_v25 = vpop.eup %2726 }
 0x367   :  { %2730 = vtanh.f32 %v913_v18  ;;  %v921_v42 = vadd.f32 1.0, %v2727_v25 }
 0x368   :  { %2732 = vrcp.f32 %v910_v23 }
 0x369   :  { %2734 = vrcp.f32 %v921_v42 }
 0x370   :  { %v2729_v29 = vpop.eup %2728 }
 0x371   :  { %v2731_v35 = vpop.eup %2730 }
 0x372   :  { %v2733_v36 = vpop.eup %2732  ;;  %v925_v48 = vmul.f32 %v2731_v35, %v2729_v29 }
 0x373   :  { %v924_v43 = vmul.f32 %v2733_v36, %v3191_v41  ;;  %v2735_v49 = vpop.eup %2734 }
 0x375   :  { %v3232_v26 = vadd.f32 %v925_v48, %v924_v43 }
 0x377   :  { %2736 = vtanh.f32 %v3232_v26 }
 0x381   :  { %v2737_v54 = vpop.eup %2736 }
 0x382   :  { %v928_v57 = vmul.f32 %v2737_v54, %v2735_v49 }
 0x384   :  { %996 = vmatmul.mubr.f32.vlgmr.msra.gmra.mrb[6].mxu0 %v928_v57  ;;  %1067 = vmatmul.mubr.f32.vlgmr.msra.gmra.mrb[10].mxu1 %v928_v57 }
 0x385   :  { %2399 = vmatpush1.bf16.msra.mxu0 %v3005_v14  ;;  %2431 = vmatpush1.bf16.msra.mxu1 %v3015_v24 }
 0x386   :  { %2401 = vmatprep.subr.bf16.mxu0 %v3011_v21  ;;  %2433 = vmatprep.subr.bf16.mxu1 %v3019_v27 }
 0x387   :  { %1200 = vmatprep.mubr.f32.mxu0 %v2919_v0  ;;  %1271 = vmatprep.mubr.f32.mxu1 %v2919_v0 }
 0x389   :  { %2403 = vmatpush1.bf16.msra.mxu0 %v3021_v28  ;;  %2435 = vmatpush1.bf16.msra.mxu1 %v3028_v38 }
 0x38a   :  { %2405 = vmatprep.subr.bf16.mxu0 %v3024_v32  ;;  %2437 = vmatprep.subr.bf16.mxu1 %v3033_v39 }
 0x38d   :  { %2407 = vmatpush1.bf16.msra.mxu0 %v3035_v40  ;;  %2439 = vmatpush1.bf16.msra.mxu1 %v3041_v50 }
 0x38e   :  { %2409 = vmatprep.subr.bf16.mxu0 %v3038_v44  ;;  %2441 = vmatprep.subr.bf16.mxu1 %v3045_v51 }
 0x391   :  { %2411 = vmatpush1.bf16.msra.mxu0 %v3047_v52  ;;  %2443 = vmatpush1.bf16.msra.mxu1 %v3053_v62 }
 0x392   :  { %2413 = vmatprep.subr.bf16.mxu0 %v3050_v56  ;;  %2445 = vmatprep.subr.bf16.mxu1 %v3057_v63 }
 0x395   :  { %2415 = vmatpush1.bf16.msra.mxu0 %v3059_v1  ;;  %2447 = vmatpush1.bf16.msra.mxu1 %v3065_v12 }
 0x396   :  { %2417 = vmatprep.subr.bf16.mxu0 %v3062_v5  ;;  %2449 = vmatprep.subr.bf16.mxu1 %v3069_v15 }
 0x399   :  { %2419 = vmatpush1.bf16.msra.mxu0 %v3071_v16  ;;  %2451 = vmatpush1.bf16.msra.mxu1 %v3077_v30 }
 0x39a   :  { %2421 = vmatprep.subr.bf16.mxu0 %v3074_v20  ;;  %2453 = vmatprep.subr.bf16.mxu1 %v3081_v31 }
 0x39d   :  { %2423 = vmatpush1.bf16.msra.mxu0 %v3083_v33  ;;  %2455 = vmatpush1.bf16.msra.mxu1 %v3089_v45 }
 0x39e   :  { %2425 = vmatprep.subr.bf16.mxu0 %v3086_v37  ;;  %2457 = vmatprep.subr.bf16.mxu1 %v3093_v46 }
 0x3a1   :  { %2427 = vmatpush1.bf16.msra.mxu0 %v3095_v47  ;;  %2459 = vmatpush1.bf16.msra.mxu1 %v3099_v53 }
 0x3a2   :  { %2461 = vmatprep.subr.bf16.mxu0 %v3000_v9  ;;  %2493 = vmatprep.subr.bf16.mxu1 %v3003_v13 }
 0x457   :  { %v997_v41 = vpop.f32.mrb[6].mxu0  ;;  %v1068_v58 = vpop.f32.mrb[10].mxu1 }
 0x458   :  { %v999_v59 = vpop.f32.mrb[7].mxu0  ;;  %v1070_v60 = vpop.f32.mrb[11].mxu1 }
 0x459   :  { %v1077_v61 = vcombine.low %v997_v41, %v999_v59  ;;  %v1078_v2 = vcombine.low %v1068_v58, %v1070_v60 }
 0x45b   :  { %v1085_v55 = vrot.slane %v1077_v61, %v3145_v34  ;;  %v1092_v3 = vrot.slane %v1078_v2, %v3145_v34 }
 0x45d   :  { %v1093_v4 = vcombine.low %v1085_v55, %v1092_v3 }
 0x45f   :  { %v1100_v6 = vrot.slane %v1093_v4, %v3145_v34 }
 0x461   :  { %v1102_v8 = vadd.f32 %v1100_v6, %v930_v7 }
 0x463   :  { %v2073_v10 = vmul.f32 -1.442695, %v1102_v8  ;;  %v1110_v11 = vrot.slane %v1102_v8, 1  ;;  %v1121_v18 = vrot.slane %v1102_v8, 3  ;;  %v1118_v23 = vrot.slane %v1102_v8, 2 }
 0x465   :  { %2738 = vpow2.f32 %v2073_v10  ;;  %v2074_v17 = vmul.f32 -1.442695, %v1110_v11  ;;  %v2075_v19 = vmul.f32 -1.442695, %v1121_v18 }
 0x466   :  { %v1135_v11 = vld [vmem:[#allocation2 + $0x4] ss:$8 sm:$0xf] }
 0x467   :  { %2740 = vpow2.f32 %v2074_v17 }
 0x468   :  { %2742 = vpow2.f32 %v2075_v19 }
 0x46f   :  { %v2739_v22 = vpop.eup %2738 }
 0x470   :  { %v1106_v25 = vadd.f32 1.0, %v2739_v22 }
 0x471   :  { %v2741_v29 = vpop.eup %2740 }
 0x472   :  { %2744 = vrcp.f32 %v1106_v25  ;;  %v1115_v35 = vadd.f32 1.0, %v2741_v29  ;;  %v2743_v36 = vpop.eup %2742 }
 0x473   :  { %2746 = vtanh.f32 %v1118_v23  ;;  %v1126_v49 = vadd.f32 1.0, %v2743_v36 }
 0x474   :  { %2748 = vrcp.f32 %v1115_v35 }
 0x475   :  { %2750 = vrcp.f32 %v1126_v49 }
 0x47c   :  { %v2745_v42 = vpop.eup %2744 }
 0x47d   :  { %v2747_v43 = vpop.eup %2746 }
 0x47e   :  { %v2749_v48 = vpop.eup %2748  ;;  %v1130_v57 = vmul.f32 %v2747_v43, %v2745_v42 }
 0x47f   :  { %v1129_v54 = vmul.f32 %v2749_v48, %v3232_v26  ;;  %v2751_v58 = vpop.eup %2750 }
 0x481   :  { %v3273_v41 = vadd.f32 %v1130_v57, %v1129_v54 }
 0x483   :  { %2752 = vtanh.f32 %v3273_v41 }
 0x48d   :  { %v2753_v59 = vpop.eup %2752 }
 0x48e   :  { %v1133_v60 = vmul.f32 %v2753_v59, %v2751_v58 }
 0x490   :  { %1201 = vmatmul.mubr.f32.vlgmr.msra.gmra.mrb[8].mxu0 %v1133_v60  ;;  %1272 = vmatmul.mubr.f32.vlgmr.msra.gmra.mrb[12].mxu1 %v1133_v60 }
 0x491   :  { %2463 = vmatpush1.bf16.msra.mxu0 %v3005_v14  ;;  %2495 = vmatpush1.bf16.msra.mxu1 %v3015_v24 }
 0x492   :  { %2465 = vmatprep.subr.bf16.mxu0 %v3011_v21  ;;  %2497 = vmatprep.subr.bf16.mxu1 %v3019_v27 }
 0x493   :  { %1405 = vmatprep.mubr.f32.mxu0 %v2919_v0  ;;  %1476 = vmatprep.mubr.f32.mxu1 %v2919_v0 }
 0x495   :  { %2467 = vmatpush1.bf16.msra.mxu0 %v3021_v28  ;;  %2499 = vmatpush1.bf16.msra.mxu1 %v3028_v38 }
 0x496   :  { %2469 = vmatprep.subr.bf16.mxu0 %v3024_v32  ;;  %2501 = vmatprep.subr.bf16.mxu1 %v3033_v39 }
 0x499   :  { %2471 = vmatpush1.bf16.msra.mxu0 %v3035_v40  ;;  %2503 = vmatpush1.bf16.msra.mxu1 %v3041_v50 }
 0x49a   :  { %2473 = vmatprep.subr.bf16.mxu0 %v3038_v44  ;;  %2505 = vmatprep.subr.bf16.mxu1 %v3045_v51 }
 0x49d   :  { %2475 = vmatpush1.bf16.msra.mxu0 %v3047_v52  ;;  %2507 = vmatpush1.bf16.msra.mxu1 %v3053_v62 }
 0x49e   :  { %2477 = vmatprep.subr.bf16.mxu0 %v3050_v56  ;;  %2509 = vmatprep.subr.bf16.mxu1 %v3057_v63 }
 0x4a1   :  { %2479 = vmatpush1.bf16.msra.mxu0 %v3059_v1  ;;  %2511 = vmatpush1.bf16.msra.mxu1 %v3065_v12 }
 0x4a2   :  { %2481 = vmatprep.subr.bf16.mxu0 %v3062_v5  ;;  %2513 = vmatprep.subr.bf16.mxu1 %v3069_v15 }
 0x4a5   :  { %2483 = vmatpush1.bf16.msra.mxu0 %v3071_v16  ;;  %2515 = vmatpush1.bf16.msra.mxu1 %v3077_v30 }
 0x4a6   :  { %2485 = vmatprep.subr.bf16.mxu0 %v3074_v20  ;;  %2517 = vmatprep.subr.bf16.mxu1 %v3081_v31 }
 0x4a9   :  { %2487 = vmatpush1.bf16.msra.mxu0 %v3083_v33  ;;  %2519 = vmatpush1.bf16.msra.mxu1 %v3089_v45 }
 0x4aa   :  { %2489 = vmatprep.subr.bf16.mxu0 %v3086_v37  ;;  %2521 = vmatprep.subr.bf16.mxu1 %v3093_v46 }
 0x4ad   :  { %2491 = vmatpush1.bf16.msra.mxu0 %v3095_v47  ;;  %2523 = vmatpush1.bf16.msra.mxu1 %v3099_v53 }
 0x4ae   :  { %2525 = vmatprep.subr.bf16.mxu0 %v3000_v9  ;;  %2557 = vmatprep.subr.bf16.mxu1 %v3003_v13 }
 0x563   :  { %v1202_v26 = vpop.f32.mrb[8].mxu0  ;;  %v1273_v61 = vpop.f32.mrb[12].mxu1 }
 0x564   :  { %v1204_v2 = vpop.f32.mrb[9].mxu0  ;;  %v1275_v55 = vpop.f32.mrb[13].mxu1 }
 0x565   :  { %v1282_v3 = vcombine.low %v1202_v26, %v1204_v2  ;;  %v1283_v4 = vcombine.low %v1273_v61, %v1275_v55 }
 0x567   :  { %v1290_v6 = vrot.slane %v1282_v3, %v3145_v34  ;;  %v1297_v7 = vrot.slane %v1283_v4, %v3145_v34 }
 0x569   :  { %v1298_v8 = vcombine.low %v1290_v6, %v1297_v7 }
 0x56b   :  { %v1305_v10 = vrot.slane %v1298_v8, %v3145_v34 }
 0x56d   :  { %v1307_v17 = vadd.f32 %v1305_v10, %v1135_v11 }
 0x56f   :  { %v2076_v18 = vmul.f32 -1.442695, %v1307_v17  ;;  %v1315_v19 = vrot.slane %v1307_v17, 1  ;;  %v1326_v23 = vrot.slane %v1307_v17, 3  ;;  %v1323_v35 = vrot.slane %v1307_v17, 2 }
 0x571   :  { %2754 = vpow2.f32 %v2076_v18  ;;  %v2077_v22 = vmul.f32 -1.442695, %v1315_v19  ;;  %v2078_v25 = vmul.f32 -1.442695, %v1326_v23 }
 0x572   :  { %v1340_v19 = vld [vmem:[#allocation2 + $0x5] ss:$8 sm:$0xf] }
 0x573   :  { %2756 = vpow2.f32 %v2077_v22 }
 0x574   :  { %2758 = vpow2.f32 %v2078_v25 }
 0x57b   :  { %v2755_v29 = vpop.eup %2754 }
 0x57c   :  { %v1311_v36 = vadd.f32 1.0, %v2755_v29 }
 0x57d   :  { %v2757_v42 = vpop.eup %2756 }
 0x57e   :  { %2760 = vrcp.f32 %v1311_v36  ;;  %v1320_v43 = vadd.f32 1.0, %v2757_v42  ;;  %v2759_v48 = vpop.eup %2758 }
 0x57f   :  { %2762 = vtanh.f32 %v1323_v35  ;;  %v1331_v58 = vadd.f32 1.0, %v2759_v48 }
 0x580   :  { %2764 = vrcp.f32 %v1320_v43 }
 0x581   :  { %2766 = vrcp.f32 %v1331_v58 }
 0x588   :  { %v2761_v49 = vpop.eup %2760 }
 0x589   :  { %v2763_v54 = vpop.eup %2762 }
 0x58a   :  { %v2765_v57 = vpop.eup %2764  ;;  %v1335_v60 = vmul.f32 %v2763_v54, %v2761_v49 }
 0x58b   :  { %v1334_v59 = vmul.f32 %v2765_v57, %v3273_v41  ;;  %v2767_v61 = vpop.eup %2766 }
 0x58d   :  { %v3314_v26 = vadd.f32 %v1335_v60, %v1334_v59 }
 0x58f   :  { %2768 = vtanh.f32 %v3314_v26 }
 0x599   :  { %v2769_v2 = vpop.eup %2768 }
 0x59a   :  { %v1338_v55 = vmul.f32 %v2769_v2, %v2767_v61 }
 0x59c   :  { %1406 = vmatmul.mubr.f32.vlgmr.msra.gmra.mrb[10].mxu0 %v1338_v55  ;;  %1477 = vmatmul.mubr.f32.vlgmr.msra.gmra.mrb[14].mxu1 %v1338_v55 }
 0x59d   :  { %2527 = vmatpush1.bf16.msra.mxu0 %v3005_v14  ;;  %2559 = vmatpush1.bf16.msra.mxu1 %v3015_v24 }
 0x59e   :  { %2529 = vmatprep.subr.bf16.mxu0 %v3011_v21  ;;  %2561 = vmatprep.subr.bf16.mxu1 %v3019_v27 }
 0x59f   :  { %1610 = vmatprep.mubr.f32.mxu0 %v2919_v0  ;;  %1681 = vmatprep.mubr.f32.mxu1 %v2919_v0 }
 0x5a1   :  { %2531 = vmatpush1.bf16.msra.mxu0 %v3021_v28  ;;  %2563 = vmatpush1.bf16.msra.mxu1 %v3028_v38 }
 0x5a2   :  { %2533 = vmatprep.subr.bf16.mxu0 %v3024_v32  ;;  %2565 = vmatprep.subr.bf16.mxu1 %v3033_v39 }
 0x5a5   :  { %2535 = vmatpush1.bf16.msra.mxu0 %v3035_v40  ;;  %2567 = vmatpush1.bf16.msra.mxu1 %v3041_v50 }
 0x5a6   :  { %2537 = vmatprep.subr.bf16.mxu0 %v3038_v44  ;;  %2569 = vmatprep.subr.bf16.mxu1 %v3045_v51 }
 0x5a9   :  { %2539 = vmatpush1.bf16.msra.mxu0 %v3047_v52  ;;  %2571 = vmatpush1.bf16.msra.mxu1 %v3053_v62 }
 0x5aa   :  { %2541 = vmatprep.subr.bf16.mxu0 %v3050_v56  ;;  %2573 = vmatprep.subr.bf16.mxu1 %v3057_v63 }
 0x5ad   :  { %2543 = vmatpush1.bf16.msra.mxu0 %v3059_v1  ;;  %2575 = vmatpush1.bf16.msra.mxu1 %v3065_v12 }
 0x5ae   :  { %2545 = vmatprep.subr.bf16.mxu0 %v3062_v5  ;;  %2577 = vmatprep.subr.bf16.mxu1 %v3069_v15 }
 0x5b1   :  { %2547 = vmatpush1.bf16.msra.mxu0 %v3071_v16  ;;  %2579 = vmatpush1.bf16.msra.mxu1 %v3077_v30 }
 0x5b2   :  { %2549 = vmatprep.subr.bf16.mxu0 %v3074_v20  ;;  %2581 = vmatprep.subr.bf16.mxu1 %v3081_v31 }
 0x5b5   :  { %2551 = vmatpush1.bf16.msra.mxu0 %v3083_v33  ;;  %2583 = vmatpush1.bf16.msra.mxu1 %v3089_v45 }
 0x5b6   :  { %2553 = vmatprep.subr.bf16.mxu0 %v3086_v37  ;;  %2585 = vmatprep.subr.bf16.mxu1 %v3093_v46 }
 0x5b9   :  { %2555 = vmatpush1.bf16.msra.mxu0 %v3095_v47  ;;  %2587 = vmatpush1.bf16.msra.mxu1 %v3099_v53 }
 0x5ba   :  { %2589 = vmatprep.subr.bf16.mxu0 %v3000_v9  ;;  %2621 = vmatprep.subr.bf16.mxu1 %v3003_v13 }
 0x66f   :  { %v1407_v41 = vpop.f32.mrb[10].mxu0  ;;  %v1478_v3 = vpop.f32.mrb[14].mxu1 }
 0x670   :  { %v1409_v4 = vpop.f32.mrb[11].mxu0  ;;  %v1480_v6 = vpop.f32.mrb[15].mxu1 }
 0x671   :  { %v1487_v7 = vcombine.low %v1407_v41, %v1409_v4  ;;  %v1488_v8 = vcombine.low %v1478_v3, %v1480_v6 }
 0x673   :  { %v1495_v10 = vrot.slane %v1487_v7, %v3145_v34  ;;  %v1502_v11 = vrot.slane %v1488_v8, %v3145_v34  ;;  %v1954_v7 = vld [vmem:[#allocation8] sm:$0xff]  ;;  %v1955_v8 = vld [vmem:[#allocation8 + $0x8] sm:$0xff] }
 0x675   :  { %v1503_v17 = vcombine.low %v1495_v10, %v1502_v11  ;;  %v2653_v10 = vpack.c.bf16 %v1955_v8, %v1954_v7  ;;  %v2921_v11 = vmov 0.0|0.0  }
 0x677   :  { %v1510_v18 = vrot.slane %v1503_v17, %v3145_v34  ;;  %v1956_v17 = vld [vmem:[#allocation8 + $0x10] sm:$0xff] }
 0x679   :  { %v1512_v22 = vadd.f32 %v1510_v18, %v1340_v19  ;;  %v1957_v18 = vld [vmem:[#allocation8 + $0x18] sm:$0xff]  ;;  %v1958_v19 = vld [vmem:[#allocation8 + $0x20] sm:$0xff] }
 0x67b   :  { %v2079_v23 = vmul.f32 -1.442695, %v1512_v22  ;;  %v1520_v25 = vrot.slane %v1512_v22, 1  ;;  %v1531_v13 = vrot.slane %v1512_v22, 3  ;;  %v1528_v36 = vrot.slane %v1512_v22, 2 }
 0x67c   :  { %v2656_v22 = vpack.c.bf16 %v1957_v18, %v1956_v17 }
 0x67d   :  { %2770 = vpow2.f32 %v2079_v23  ;;  %v2080_v9 = vmul.f32 -1.442695, %v1520_v25  ;;  %v2081_v29 = vmul.f32 -1.442695, %v1531_v13  ;;  %v1959_v23 = vld [vmem:[#allocation8 + $0x28] sm:$0xff]  ;;  %v1961_v13 = vld [vmem:[#allocation8 + $0x38] sm:$0xff] }
 0x67e   :  { %v2659_v25 = vpack.c.bf16 %v1959_v23, %v1958_v19 }
 0x67f   :  { %2772 = vpow2.f32 %v2080_v9  ;;  %v1960_v9 = vld [vmem:[#allocation8 + $0x30] sm:$0xff] }
 0x680   :  { %2774 = vpow2.f32 %v2081_v29  ;;  %v2662_v29 = vpack.c.bf16 %v1961_v13, %v1960_v9 }
 0x687   :  { %v2771_v35 = vpop.eup %2770 }
 0x688   :  { %v1516_v42 = vadd.f32 1.0, %v2771_v35  ;;  %v1962_v35 = vld [vmem:[#allocation8 + $0x40] sm:$0xff] }
 0x689   :  { %v2773_v43 = vpop.eup %2772 }
 0x68a   :  { %2776 = vrcp.f32 %v1516_v42  ;;  %v1525_v48 = vadd.f32 1.0, %v2773_v43  ;;  %v2775_v49 = vpop.eup %2774  ;;  %v1964_v43 = vld [vmem:[#allocation8 + $0x50] sm:$0xff] }
 0x68b   :  { %2778 = vtanh.f32 %v1528_v36  ;;  %v1536_v59 = vadd.f32 1.0, %v2775_v49  ;;  %v1963_v36 = vld [vmem:[#allocation8 + $0x48] sm:$0xff] }
 0x68c   :  { %2780 = vrcp.f32 %v1525_v48  ;;  %v2665_v42 = vpack.c.bf16 %v1963_v36, %v1962_v35  ;;  %v1965_v48 = vld [vmem:[#allocation8 + $0x58] sm:$0xff] }
 0x68d   :  { %2782 = vrcp.f32 %v1536_v59  ;;  %v2668_v49 = vpack.c.bf16 %v1965_v48, %v1964_v43  ;;  %v1969_v59 = vld [vmem:[#allocation8 + $0x78] sm:$0xff] }
 0x694   :  { %v2777_v54 = vpop.eup %2776 }
 0x695   :  { %v2779_v57 = vpop.eup %2778 }
 0x696   :  { %v2781_v58 = vpop.eup %2780  ;;  %v1540_v61 = vmul.f32 %v2779_v57, %v2777_v54  ;;  %v1966_v54 = vld [vmem:[#allocation8 + $0x60] sm:$0xff] }
 0x697   :  { %v1539_v60 = vmul.f32 %v2781_v58, %v3314_v26  ;;  %v2783_v55 = vpop.eup %2782  ;;  %v1968_v58 = vld [vmem:[#allocation8 + $0x70] sm:$0xff] }
 0x699   :  { %v3355_v2 = vadd.f32 %v1540_v61, %v1539_v60  ;;  %v2674_v60 = vpack.c.bf16 %v1969_v59, %v1968_v58 }
 0x69b   :  { %2784 = vtanh.f32 %v3355_v2 }
 0x6a5   :  { %v2785_v41 = vpop.eup %2784 }
 0x6a6   :  { %v1543_v3 = vmul.f32 %v2785_v41, %v2783_v55 }
 0x6a8   :  { %1611 = vmatmul.mubr.f32.vlgmr.msra.gmra.mrb[12].mxu0 %v1543_v3  ;;  %1682 = vmatmul.mubr.f32.vlgmr.msra.gmra.mrb[16].mxu1 %v1543_v3 }
 0x6a9   :  { %2591 = vmatpush1.bf16.msra.mxu0 %v3005_v14  ;;  %2623 = vmatpush1.bf16.msra.mxu1 %v3015_v24 }
 0x6aa   :  { %2593 = vmatprep.subr.bf16.mxu0 %v3011_v21  ;;  %2625 = vmatprep.subr.bf16.mxu1 %v3019_v27 }
 0x6ab   :  { %1815 = vmatprep.mubr.f32.mxu0 %v2919_v0  ;;  %1886 = vmatprep.mubr.f32.mxu1 %v2919_v0 }
 0x6ad   :  { %2595 = vmatpush1.bf16.msra.mxu0 %v3021_v28  ;;  %2627 = vmatpush1.bf16.msra.mxu1 %v3028_v38 }
 0x6ae   :  { %2597 = vmatprep.subr.bf16.mxu0 %v3024_v32  ;;  %2629 = vmatprep.subr.bf16.mxu1 %v3033_v39 }
 0x6b1   :  { %2599 = vmatpush1.bf16.msra.mxu0 %v3035_v40  ;;  %2631 = vmatpush1.bf16.msra.mxu1 %v3041_v50  ;;  %v1545_v50 = vld [vmem:[#allocation2 + $0x6] ss:$8 sm:$0xf] }
 0x6b2   :  { %2601 = vmatprep.subr.bf16.mxu0 %v3038_v44  ;;  %2633 = vmatprep.subr.bf16.mxu1 %v3045_v51 }
 0x6b5   :  { %2603 = vmatpush1.bf16.msra.mxu0 %v3047_v52  ;;  %2635 = vmatpush1.bf16.msra.mxu1 %v3053_v62 }
 0x6b6   :  { %2605 = vmatprep.subr.bf16.mxu0 %v3050_v56  ;;  %2637 = vmatprep.subr.bf16.mxu1 %v3057_v63 }
 0x6b9   :  { %2607 = vmatpush1.bf16.msra.mxu0 %v3059_v1  ;;  %2639 = vmatpush1.bf16.msra.mxu1 %v3065_v12 }
 0x6ba   :  { %2609 = vmatprep.subr.bf16.mxu0 %v3062_v5  ;;  %2641 = vmatprep.subr.bf16.mxu1 %v3069_v15 }
 0x6bd   :  { %2611 = vmatpush1.bf16.msra.mxu0 %v3071_v16  ;;  %2643 = vmatpush1.bf16.msra.mxu1 %v3077_v30 }
 0x6be   :  { %2613 = vmatprep.subr.bf16.mxu0 %v3074_v20  ;;  %2645 = vmatprep.subr.bf16.mxu1 %v3081_v31 }
 0x6c1   :  { %2615 = vmatpush1.bf16.msra.mxu0 %v3083_v33  ;;  %2647 = vmatpush1.bf16.msra.mxu1 %v3089_v45 }
 0x6c2   :  { %2617 = vmatprep.subr.bf16.mxu0 %v3086_v37  ;;  %2649 = vmatprep.subr.bf16.mxu1 %v3093_v46 }
 0x6c5   :  { %2619 = vmatpush1.bf16.msra.mxu0 %v3095_v47  ;;  %2651 = vmatpush1.bf16.msra.mxu1 %v3099_v53 }
 0x6c6   :  { %2652 = vmatprep.subr.bf16.mxu0 %v2921_v11 }
 0x77b   :  { %v1612_v14 = vpop.f32.mrb[12].mxu0  ;;  %v1683_v21 = vpop.f32.mrb[16].mxu1 }
 0x77c   :  { %v1614_v24 = vpop.f32.mrb[13].mxu0  ;;  %v1685_v27 = vpop.f32.mrb[17].mxu1 }
 0x77d   :  { %v1692_v28 = vcombine.low %v1612_v14, %v1614_v24  ;;  %v1693_v32 = vcombine.low %v1683_v21, %v1685_v27 }
 0x77f   :  { %v1700_v38 = vrot.slane %v1692_v28, %v3145_v34  ;;  %v1707_v39 = vrot.slane %v1693_v32, %v3145_v34  ;;  %v1750_v32 = vld [vmem:[#allocation2 + $0x7] ss:$8 sm:$0xf] }
 0x781   :  { %v1708_v40 = vcombine.low %v1700_v38, %v1707_v39 }
 0x783   :  { %v1715_v44 = vrot.slane %v1708_v40, %v3145_v34 }
 0x785   :  { %v1717_v51 = vadd.f32 %v1715_v44, %v1545_v50 }
 0x787   :  { %v2082_v52 = vmul.f32 -1.442695, %v1717_v51  ;;  %v1725_v56 = vrot.slane %v1717_v51, 1  ;;  %v1736_v63 = vrot.slane %v1717_v51, 3  ;;  %v1733_v12 = vrot.slane %v1717_v51, 2 }
 0x789   :  { %2786 = vpow2.f32 %v2082_v52  ;;  %v2083_v62 = vmul.f32 -1.442695, %v1725_v56  ;;  %v2084_v1 = vmul.f32 -1.442695, %v1736_v63 }
 0x78b   :  { %2788 = vpow2.f32 %v2083_v62 }
 0x78c   :  { %2790 = vpow2.f32 %v2084_v1 }
 0x793   :  { %v2787_v5 = vpop.eup %2786 }
 0x794   :  { %v1721_v15 = vadd.f32 1.0, %v2787_v5 }
 0x795   :  { %v2789_v16 = vpop.eup %2788 }
 0x796   :  { %2792 = vrcp.f32 %v1721_v15  ;;  %v1730_v20 = vadd.f32 1.0, %v2789_v16  ;;  %v2791_v30 = vpop.eup %2790 }
 0x797   :  { %2794 = vtanh.f32 %v1733_v12  ;;  %v1741_v45 = vadd.f32 1.0, %v2791_v30 }
 0x798   :  { %2796 = vrcp.f32 %v1730_v20 }
 0x799   :  { %2798 = vrcp.f32 %v1741_v45 }
 0x7a0   :  { %v2793_v31 = vpop.eup %2792 }
 0x7a1   :  { %v2795_v33 = vpop.eup %2794 }
 0x7a2   :  { %v2797_v37 = vpop.eup %2796  ;;  %v1745_v47 = vmul.f32 %v2795_v33, %v2793_v31 }
 0x7a3   :  { %v1744_v46 = vmul.f32 %v2797_v37, %v3355_v2  ;;  %v2799_v26 = vpop.eup %2798 }
 0x7a5   :  { %v3394_v53 = vadd.f32 %v1745_v47, %v1744_v46  ;;  %v1970_v46 = vld [vmem:[%s3422_s5] sm:$0x1] }
 0x7a7   :  { %2800 = vtanh.f32 %v3394_v53 }
 0x7b1   :  { %v2801_v4 = vpop.eup %2800 }
 0x7b2   :  { %v1748_v6 = vmul.f32 %v2801_v4, %v2799_v26 }
 0x7b4   :  { %1816 = vmatmul.mubr.f32.vlgmr.msra.gmra.mrb[14].mxu0 %v1748_v6  ;;  %1887 = vmatmul.mubr.f32.vlgmr.msra.gmra.mrb[18].mxu1 %v1748_v6 }
 0x7b5   :  { %2654 = vmatpush3.bf16.msra.mxu0 %v2653_v10  ;;  %2137 = vmatprep.mubr.msk.f32.mxu0 %vm2922_vm2, %v2919_v0  ;;  %v1967_v0 = vld [vmem:[#allocation8 + $0x68] sm:$0xff] }
 0x7b6   :  { %2655 = vmatprep.subr.bf16.mxu0 %v2921_v11  ;;  %v2671_v57 = vpack.c.bf16 %v1967_v0, %v1966_v54 }
 0x7b9   :  { %2657 = vmatpush3.bf16.msra.mxu0 %v2656_v22 }
 0x7ba   :  { %2658 = vmatprep.subr.bf16.mxu0 %v2921_v11 }
 0x7bd   :  { %2660 = vmatpush3.bf16.msra.mxu0 %v2659_v25 }
 0x7be   :  { %2661 = vmatprep.subr.bf16.mxu0 %v2921_v11 }
 0x7c1   :  { %2663 = vmatpush3.bf16.msra.mxu0 %v2662_v29 }
 0x7c2   :  { %2664 = vmatprep.subr.bf16.mxu0 %v2921_v11 }
 0x7c5   :  { %2666 = vmatpush3.bf16.msra.mxu0 %v2665_v42 }
 0x7c6   :  { %2667 = vmatprep.subr.bf16.mxu0 %v2921_v11 }
 0x7c9   :  { %2669 = vmatpush3.bf16.msra.mxu0 %v2668_v49 }
 0x7ca   :  { %2670 = vmatprep.subr.bf16.mxu0 %v2921_v11 }
 0x7cd   :  { %2672 = vmatpush3.bf16.msra.mxu0 %v2671_v57 }
 0x7ce   :  { %2673 = vmatprep.subr.bf16.mxu0 %v2921_v11 }
 0x7d1   :  { %2675 = vmatpush3.bf16.msra.mxu0 %v2674_v60 }
 0x887   :  { %v1817_v61 = vpop.f32.mrb[14].mxu0  ;;  %v1888_v2 = vpop.f32.mrb[18].mxu1 }
 0x888   :  { %v1819_v55 = vpop.f32.mrb[15].mxu0  ;;  %v1890_v41 = vpop.f32.mrb[19].mxu1 }
 0x889   :  { %v1897_v3 = vcombine.low %v1817_v61, %v1819_v55  ;;  %v1898_v14 = vcombine.low %v1888_v2, %v1890_v41 }
 0x88b   :  { %v1905_v21 = vrot.slane %v1897_v3, %v3145_v34  ;;  %v1912_v24 = vrot.slane %v1898_v14, %v3145_v34 }
 0x88d   :  { %v1913_v27 = vcombine.low %v1905_v21, %v1912_v24 }
 0x88f   :  { %v1920_v28 = vrot.slane %v1913_v27, %v3145_v34 }
 0x891   :  { %v1922_v38 = vadd.f32 %v1920_v28, %v1750_v32 }
 0x893   :  { %v2085_v39 = vmul.f32 -1.442695, %v1922_v38  ;;  %v1930_v40 = vrot.slane %v1922_v38, 1  ;;  %v1941_v50 = vrot.slane %v1922_v38, 3  ;;  %v1938_v56 = vrot.slane %v1922_v38, 2 }
 0x895   :  { %2802 = vpow2.f32 %v2085_v39  ;;  %v2086_v44 = vmul.f32 -1.442695, %v1930_v40  ;;  %v2087_v51 = vmul.f32 -1.442695, %v1941_v50 }
 0x897   :  { %2804 = vpow2.f32 %v2086_v44 }
 0x898   :  { %2806 = vpow2.f32 %v2087_v51 }
 0x89f   :  { %v2803_v52 = vpop.eup %2802 }
 0x8a0   :  { %v1926_v62 = vadd.f32 1.0, %v2803_v52 }
 0x8a1   :  { %v2805_v63 = vpop.eup %2804 }
 0x8a2   :  { %2808 = vrcp.f32 %v1926_v62  ;;  %v1935_v1 = vadd.f32 1.0, %v2805_v63  ;;  %v2807_v5 = vpop.eup %2806 }
 0x8a3   :  { %2810 = vtanh.f32 %v1938_v56  ;;  %v1946_v16 = vadd.f32 1.0, %v2807_v5 }
 0x8a4   :  { %2812 = vrcp.f32 %v1935_v1 }
 0x8a5   :  { %2814 = vrcp.f32 %v1946_v16 }
 0x8ac   :  { %v2809_v34 = vpop.eup %2808 }
 0x8ad   :  { %v2811_v12 = vpop.eup %2810 }
 0x8ae   :  { %v2813_v15 = vpop.eup %2812  ;;  %v1950_v30 = vmul.f32 %v2811_v12, %v2809_v34 }
 0x8af   :  { %v1949_v20 = vmul.f32 %v2813_v15, %v3394_v53  ;;  %v2815_v33 = vpop.eup %2814 }
 0x8b1   :  { %v1951_v31 = vadd.f32 %v1950_v30, %v1949_v20 }
 0x8b3   :  { %2816 = vtanh.f32 %v1951_v31 }
 0x8bd   :  { %v2817_v37 = vpop.eup %2816 }
 0x8be   :  { %v1953_v45 = vmul.f32 %v2817_v37, %v2815_v33 }
 0x8c0   :  { %2138 = vmatmul.mubr.f32.vlgmr.msra.gmra.mrb[16].mxu0 %v1953_v45 }
 0x993   :  { %v2037_v47 = vpop.f32.mrb[16].mxu0 }
 0x994   :  { %v2038_v26 = vadd.f32 %v2037_v47, %v1970_v46  ;;  %v2139_v4 = vpop.f32.mrb[17].mxu0 }
 0x996   :  { %2041 = vst [vmem:[#allocation9] sm:$0x1] %v2038_v26 }
 0x997   :  { %2895 = shalt.err (!%p2892_p0)
}
 0x998   :  { %s2896_s20 = scalar_lea.hbm %s3423_s6, 16 }
 0x999   :  { %p2897_p1 = scmp.ne.s32.totalorder %s3423_s6, %s2896_s20  ;;  %p2900_p2 = scmp.lt.u32.totalorder %s2896_s20, %s3423_s6 }
 0x99b   :  { %p2902_p3 = pnand %p2900_p2, %p2897_p1 }
 0x99d   :  { %2905 = shalt.err (!%p2902_p3)
}
 0x99e   :  { %2051 = dma.vmem_to_hbm [thread:$0]  %s2049_s15, 16, %s3423_s6, [#allocation5]  }
 0x99f   :  { %2910 = dma.done.wait [#allocation5], 16  }
 0x9a0   :  { %2911 = vsyncadd [#allocation5], 4294967280 }
 0x9a1   :  { %2055 = vsyncpa [#allocation4], 1 }
 0x9a2   :  { %2056 = vsyncpa [#allocation7], 1 }
 0x9a3   :  { %2057 = vsyncpa [#allocation5], 1 }

</bundles_post_ra>
